<compile_context>
chip_gen: v7x
topology: tpu7x:2x2x1
jax: 0.10.0
libtpu: 0.0.40
codegen_flags: <defaults>
</compile_context>

<pallas_src>
import jax
import jax.numpy as jnp
from jax.experimental import pallas as pl
from jax.experimental.pallas import tpu as pltpu


def _unit2mel_kernel(units_ref, fvm_ref, spkb_ref, wu_ref, wfv_ref, out_ref):
    # units_ref: (TM, U) bf16   gathered hubert units for this row tile
    # fvm_ref:   (TM, 3) f32    [log1p(f0/700), volume, mask(mel2ph > 0)]
    # spkb_ref:  (TM, H) f32    g @ speaker_map + (b_unit + b_f0 + b_vol)
    # wu_ref:    (U, H)  bf16   W_unit^T
    # wfv_ref:   (2, H)  f32    [W_f0^T ; W_vol^T]
    # out_ref:   (H, TM) f32    channels-first output tile (transpose fused)
    xu = jnp.dot(units_ref[...], wu_ref[...],
                 preferred_element_type=jnp.float32)          # (TM, H), MXU bf16
    fvm = fvm_ref[...]                                        # (TM, 3)
    x = fvm[:, 2:3] * xu                                      # zero rows where mel2ph == 0
    x = x + fvm[:, 0:1] * wfv_ref[0:1, :]                     # f0_embed (bias folded into spkb)
    x = x + fvm[:, 1:2] * wfv_ref[1:2, :]                     # volume_embed
    x = x + spkb_ref[...]                                     # speaker mix + all biases
    out_ref[...] = jnp.transpose(x, (1, 0))                   # fused (T,H)->(H,T) transpose


def _pick_tile_m(tile_m, U, H, budget_bytes=40 * 1024 * 1024):
    """Cap the row tile so double-buffered blocks fit a conservative VMEM budget
    (v7x: 64 MiB physical; v5e/v6e default scoped limits 16/32 MiB are raised via
    vmem_limit_bytes)."""
    tile_m = max(128, (tile_m // 128) * 128)   # output lane dim must be a multiple of 128
    # per-row bytes: bf16 units + f32 spkb + f32 output (double-buffered),
    # lane-padded fvm block, plus the f32 intermediate.
    per_row = 2 * (2 * U + 4 * H + 4 * H) + 2 * 4 * 128 + 4 * H
    while tile_m > 128 and tile_m * per_row > budget_bytes:
        tile_m -= 128
    return tile_m


def unit2mel_v2_forward(params, units, mel2ph, f0, volume, g, *, tile_m=512):
    """JAX/Pallas equivalent of Unit2MelV2.forward (simple path, n_spk > 1).

    units:  (B, T, U) float32
    mel2ph: (B, T)    int32   (0 selects the zero-padded frame)
    f0:     (B, T)    float32
    volume: (B, T)    float32
    g:      (T, S)    float32 speaker mix
    returns (B, H, T) float32
    """
    B, T, U = units.shape
    H = params["w_unit"].shape[1]

    tile_m = _pick_tile_m(tile_m, U, H)
    T_pad = -(-T // tile_m) * tile_m
    n_t = T_pad // tile_m
    pad_t = T_pad - T

    # --- cheap (B,T)-scale prep in XLA ---
    mel2ph_p = jnp.pad(mel2ph, ((0, 0), (0, pad_t)))
    f0_p = jnp.pad(f0, ((0, 0), (0, pad_t)))
    vol_p = jnp.pad(volume, ((0, 0), (0, pad_t)))

    # gather without F.pad: clamp indices, mel2ph==0 rows are masked in-kernel
    idx = jnp.clip(mel2ph_p - 1, 0, T - 1)
    units_g = jnp.take_along_axis(
        units, jnp.broadcast_to(idx[:, :, None], (B, T_pad, U)), axis=1)
    units_g = units_g.astype(jnp.bfloat16)                    # (B, T_pad, U)

    mask = (mel2ph_p > 0).astype(jnp.float32)
    fvm = jnp.stack([jnp.log1p(f0_p / 700.0), vol_p, mask],
                    axis=-1).astype(jnp.float32)              # (B, T_pad, 3)

    wu = params["w_unit"].astype(jnp.bfloat16)                # (U, H)
    wfv = jnp.concatenate([params["w_f0"], params["w_vol"]],
                          axis=0).astype(jnp.float32)         # (2, H)
    b_all = params["b_unit"] + params["b_f0"] + params["b_vol"]        # (1, H)
    spkb = g.astype(jnp.float32) @ params["spk_map"] + b_all            # (T, H)
    spkb = jnp.pad(spkb, ((0, pad_t), (0, 0)))                          # (T_pad, H)

    grid_spec = pltpu.PrefetchScalarGridSpec(
        num_scalar_prefetch=0,
        grid=(B, n_t),
        in_specs=[
            pl.BlockSpec((None, tile_m, U), lambda b, t: (b, t, 0)),   # units (bf16)
            pl.BlockSpec((None, tile_m, 3), lambda b, t: (b, t, 0)),   # [f0feat, vol, mask]
            pl.BlockSpec((tile_m, H), lambda b, t: (t, 0)),            # spk mix + biases
            pl.BlockSpec((U, H), lambda b, t: (0, 0)),                 # W_unit^T (bf16)
            pl.BlockSpec((2, H), lambda b, t: (0, 0)),                 # [W_f0^T ; W_vol^T]
        ],
        out_specs=pl.BlockSpec((None, H, tile_m), lambda b, t: (b, 0, t)),
    )

    out = pl.pallas_call(
        _unit2mel_kernel,
        out_shape=jax.ShapeDtypeStruct((B, H, T_pad), jnp.float32),
        grid_spec=grid_spec,
        compiler_params=pltpu.CompilerParams(
            dimension_semantics=("parallel", "parallel"),
            vmem_limit_bytes=48 * 1024 * 1024),
    )(units_g, fvm, spkb, wu, wfv)

    return out[:, :, :T]                                      # (B, H, T) channels-first


def _reference(params, units, mel2ph, f0, volume, g):
    """Pure-JAX reference mirroring the PyTorch forward (pad + gather)."""
    B, T, U = units.shape
    decoder_inp = jnp.pad(units, ((0, 0), (1, 0), (0, 0)))
    idx = jnp.broadcast_to(mel2ph[:, :, None], (B, T, U))
    ug = jnp.take_along_axis(decoder_inp, idx, axis=1)
    x = ug @ params["w_unit"] + params["b_unit"]
    x = x + jnp.log1p(f0[..., None] / 700.0) * params["w_f0"] + params["b_f0"]
    x = x + volume[..., None] * params["w_vol"] + params["b_vol"]
    x = x + (g @ params["spk_map"])[None, :, :]
    return jnp.transpose(x, (0, 2, 1))


def _init_params(key, input_channel, n_hidden, n_spk):
    ks = jax.random.split(key, 8)
    s = 0.05
    return {
        # stored pre-transposed: Linear(in, out) weight^T  -> (in, out)
        "w_unit": s * jax.random.normal(ks[0], (input_channel, n_hidden), jnp.float32),
        "b_unit": s * jax.random.normal(ks[1], (1, n_hidden), jnp.float32),
        "w_f0":   s * jax.random.normal(ks[2], (1, n_hidden), jnp.float32),
        "b_f0":   s * jax.random.normal(ks[3], (1, n_hidden), jnp.float32),
        "w_vol":  s * jax.random.normal(ks[4], (1, n_hidden), jnp.float32),
        "b_vol":  s * jax.random.normal(ks[5], (1, n_hidden), jnp.float32),
        # speaker_map as built in init_spkembed: (n_spk, n_hidden)
        "spk_map": s * jax.random.normal(ks[6], (n_spk, n_hidden), jnp.float32),
    }


if __name__ == "__main__":
    B, T = 2, 16            # batch, n_frames
    U = 64                  # input_channel (hubert units)
    H = 128                 # n_hidden
    S = 4                   # n_spk

    key = jax.random.PRNGKey(0)
    kp, ku, km, kf, kv, kg = jax.random.split(key, 6)

    params = _init_params(kp, U, H, S)

    units = jax.random.normal(ku, (B, T, U), jnp.float32)
    mel2ph = jax.random.randint(km, (B, T), 0, T + 1, dtype=jnp.int32)
    f0 = 200.0 + 50.0 * jax.random.normal(kf, (B, T), jnp.float32)
    f0 = jnp.abs(f0)                       # keep 1 + f0/700 > 0
    volume = jax.random.normal(kv, (B, T), jnp.float32)
    g_mix = jax.nn.softmax(jax.random.normal(kg, (T, S), jnp.float32), axis=-1)

    out = unit2mel_v2_forward(params, units, mel2ph, f0, volume, g_mix)
    out = jax.block_until_ready(out)

    ref = _reference(params, units, mel2ph, f0, volume, g_mix)
    assert out.shape == (B, H, T), out.shape
    assert bool(jnp.allclose(out, ref, rtol=2e-2, atol=2e-2)), "mismatch vs reference"

    print("KERNEL_OK")
</pallas_src>

<mosaic_0001>
module attributes {stable_mosaic.version = 11 : i64} {
  func.func @_unit2mel_kernel(%arg0: i32, %arg1: i32, %arg2: memref<1x512x64xbf16, #tpu.memory_space<vmem>>, %arg3: memref<1x512x3xf32, #tpu.memory_space<vmem>>, %arg4: memref<512x128xf32, #tpu.memory_space<vmem>>, %arg5: memref<64x128xbf16, #tpu.memory_space<vmem>>, %arg6: memref<2x128xf32, #tpu.memory_space<vmem>>, %arg7: memref<1x128x512xf32, #tpu.memory_space<vmem>>) attributes {dimension_semantics = [#tpu.dimension_semantics<parallel>, #tpu.dimension_semantics<parallel>], iteration_bounds = array<i64: 2, 1>, scalar_prefetch = 0 : i64, scratch_operands = 0 : i64, tpu.core_type = #tpu.core_type<tc>, window_params = [{transform_indices = @transform_0, window_bounds = array<i64: 1, 512, 64>}, {transform_indices = @transform_1, window_bounds = array<i64: 1, 512, 3>}, {transform_indices = @transform_2, window_bounds = array<i64: 512, 128>}, {pipeline_mode = #tpu.pipeline_mode<synchronous>, transform_indices = @transform_3, window_bounds = array<i64: 64, 128>}, {pipeline_mode = #tpu.pipeline_mode<synchronous>, transform_indices = @transform_4, window_bounds = array<i64: 2, 128>}, {transform_indices = @transform_5, window_bounds = array<i64: 1, 128, 512>}]} {
    %c0 = arith.constant 0 : index
    %c0_0 = arith.constant 0 : index
    %c0_1 = arith.constant 0 : index
    %0 = vector.load %arg2[%c0, %c0_0, %c0_1] : memref<1x512x64xbf16, #tpu.memory_space<vmem>>, vector<1x512x64xbf16>
    %1 = vector.shape_cast %0 : vector<1x512x64xbf16> to vector<512x64xbf16>
    %c0_2 = arith.constant 0 : index
    %c0_3 = arith.constant 0 : index
    %2 = vector.load %arg5[%c0_2, %c0_3] : memref<64x128xbf16, #tpu.memory_space<vmem>>, vector<64x128xbf16>
    %cst = arith.constant dense<0.000000e+00> : vector<512x128xf32>
    %3 = tpu.matmul %1, %2, %cst {dimension_numbers = #tpu.dot_dimension_numbers<[1], [0], [0], [1], [0, 0, 1, 1], [], []>} : vector<512x64xbf16>, vector<64x128xbf16>, vector<512x128xf32> -> vector<512x128xf32>
    %c0_4 = arith.constant 0 : index
    %c0_5 = arith.constant 0 : index
    %c0_6 = arith.constant 0 : index
    %4 = vector.load %arg3[%c0_4, %c0_5, %c0_6] : memref<1x512x3xf32, #tpu.memory_space<vmem>>, vector<1x512x3xf32>
    %5 = vector.shape_cast %4 : vector<1x512x3xf32> to vector<512x3xf32>
    %6 = vector.extract_strided_slice %5 {offsets = [0, 2], sizes = [512, 1], strides = [1, 1]} : vector<512x3xf32> to vector<512x1xf32>
    %7 = vector.broadcast %6 : vector<512x1xf32> to vector<512x128xf32>
    %8 = arith.mulf %7, %3 : vector<512x128xf32>
    %9 = vector.extract_strided_slice %5 {offsets = [0, 0], sizes = [512, 1], strides = [1, 1]} : vector<512x3xf32> to vector<512x1xf32>
    %c0_7 = arith.constant 0 : index
    %c0_8 = arith.constant 0 : index
    %10 = vector.load %arg6[%c0_7, %c0_8] : memref<2x128xf32, #tpu.memory_space<vmem>>, vector<1x128xf32>
    %11 = vector.broadcast %9 : vector<512x1xf32> to vector<512x128xf32>
    %12 = vector.broadcast %10 : vector<1x128xf32> to vector<512x128xf32>
    %13 = arith.mulf %11, %12 : vector<512x128xf32>
    %14 = arith.addf %8, %13 : vector<512x128xf32>
    %15 = vector.extract_strided_slice %5 {offsets = [0, 1], sizes = [512, 1], strides = [1, 1]} : vector<512x3xf32> to vector<512x1xf32>
    %c1 = arith.constant 1 : index
    %c0_9 = arith.constant 0 : index
    %16 = vector.load %arg6[%c1, %c0_9] : memref<2x128xf32, #tpu.memory_space<vmem>>, vector<1x128xf32>
    %17 = vector.broadcast %15 : vector<512x1xf32> to vector<512x128xf32>
    %18 = vector.broadcast %16 : vector<1x128xf32> to vector<512x128xf32>
    %19 = arith.mulf %17, %18 : vector<512x128xf32>
    %20 = arith.addf %14, %19 : vector<512x128xf32>
    %c0_10 = arith.constant 0 : index
    %c0_11 = arith.constant 0 : index
    %21 = vector.load %arg4[%c0_10, %c0_11] : memref<512x128xf32, #tpu.memory_space<vmem>>, vector<512x128xf32>
    %22 = arith.addf %20, %21 : vector<512x128xf32>
    %23 = tpu.transpose %22, [1, 0] : vector<512x128xf32> -> vector<128x512xf32>
    %c0_12 = arith.constant 0 : index
    %c0_13 = arith.constant 0 : index
    %c0_14 = arith.constant 0 : index
    %24 = vector.load %arg7[%c0_12, %c0_13, %c0_14] : memref<1x128x512xf32, #tpu.memory_space<vmem>>, vector<1x128x512xf32>
    %25 = vector.shape_cast %24 : vector<1x128x512xf32> to vector<128x512xf32>
    %26 = vector.shape_cast %23 : vector<128x512xf32> to vector<1x128x512xf32>
    tpu.vector_store %arg7[%c0_12, %c0_13, %c0_14], %26 {strides = array<i32>} : memref<1x128x512xf32, #tpu.memory_space<vmem>>, vector<1x128x512xf32>,
    return
  }
  func.func @transform_0(%arg0: i32, %arg1: i32) -> (i32, i32, i32) {
    %c0_i32 = arith.constant 0 : i32
    %c0_i32_0 = arith.constant 0 : i32
    return %arg0, %arg1, %c0_i32 : i32, i32, i32
  }
  func.func @transform_1(%arg0: i32, %arg1: i32) -> (i32, i32, i32) {
    %c0_i32 = arith.constant 0 : i32
    %c0_i32_0 = arith.constant 0 : i32
    return %arg0, %arg1, %c0_i32 : i32, i32, i32
  }
  func.func @transform_2(%arg0: i32, %arg1: i32) -> (i32, i32) {
    %c0_i32 = arith.constant 0 : i32
    %c0_i32_0 = arith.constant 0 : i32
    return %arg1, %c0_i32 : i32, i32
  }
  func.func @transform_3(%arg0: i32, %arg1: i32) -> (i32, i32) {
    %c0_i32 = arith.constant 0 : i32
    %c0_i32_0 = arith.constant 0 : i32
    %c0_i32_1 = arith.constant 0 : i32
    return %c0_i32, %c0_i32_0 : i32, i32
  }
  func.func @transform_4(%arg0: i32, %arg1: i32) -> (i32, i32) {
    %c0_i32 = arith.constant 0 : i32
    %c0_i32_0 = arith.constant 0 : i32
    %c0_i32_1 = arith.constant 0 : i32
    return %c0_i32, %c0_i32_0 : i32, i32
  }
  func.func @transform_5(%arg0: i32, %arg1: i32) -> (i32, i32, i32) {
    %c0_i32 = arith.constant 0 : i32
    %c0_i32_0 = arith.constant 0 : i32
    return %arg0, %c0_i32, %arg1 : i32, i32, i32
  }
}

</mosaic_0001>

<bundles_post_ra>
// kernel: tpu_custom_call.1
= control target key start
LH: loop header
LB: loop body
LE: loop exit
PB: predicated region body
PF: predicated region fallthrough
CT: control target
= control target key end

     0   :  { %10 = vsyncpa [#allocation3], 0  ;;  %s4707_s0 = inlined_call_operand.vmem [shape: bf16[2,512,64], index: 0, kind: input, shape index: {}]   ;;  %s4708_s1 = inlined_call_operand.vmem [shape: f32[2,512,3], index: 1, kind: input, shape index: {}]   ;;  %s4709_s2 = inlined_call_operand.vmem [shape: f32[512,128], index: 2, kind: input, shape index: {}]   ;;  %s4710_s3 = inlined_call_operand.vmem [shape: bf16[64,128], index: 3, kind: input, shape index: {}]   ;;  %s4711_s4 = inlined_call_operand.vmem [shape: f32[2,128], index: 4, kind: input, shape index: {}]   ;;  %s4712_s5 = inlined_call_operand.hbm [shape: f32[2,128,512], index: 5, kind: output, shape index: {}]  }
   0x1   :  { %12 = vsyncpa [#allocation3 + $0x1], 0  ;;  %s3052_s18 = smov 0   ;;  %s3054_s19 = smov 0  }
   0x2   :  { %s3056_s20 = smov 0   ;;  %s3058_s21 = smov 0  }
   0x3   :  { %s3060_s22 = smov 0   ;;  %s3062_s23 = smov 0  }
   0x4 LB: > { %s2629_s24 = sadd.s32 4294967295, %s3014_s23   ;;  %s2630_s25 = sadd.s32 4294967294, %s3014_s23   ;;  %s3014_s23 = sphi %s3062_s23, %s18_s23   ;;  %s3010_s22 = sphi %s3060_s22, %s5078_s22   ;;  %s3006_s21 = sphi %s3058_s21, %s5077_s21   ;;  %s3002_s20 = sphi %s3056_s20, %s5076_s20   ;;  %s2998_s19 = sphi %s3054_s19, %s5075_s19   ;;  %s2994_s18 = sphi %s3052_s18, %s5074_s18  }
   0x5   : > { %s30_s26 = sadd.s32 1, %s3010_s22  ;;  %s163_s27 = sadd.s32 1, %s3002_s20 }
   0x6   : > { %p32_p0 = scmp.ge.s32.totalorder %s30_s26, 2  ;;  %p173_p1 = scmp.ne.s32.totalorder %s3002_s20, %s2998_s19 }
   0x7   : > { %p174_p2 = scmp.eq.s32.totalorder %s2629_s24, 1  ;;  %p179_p3 = scmp.ne.s32.totalorder %s2998_s19, %s2994_s18 }
   0x8   : > { %s5080_s26 = smov (%p32_p0, %s30_s26), 0  ;;  %p180_p5 = scmp.eq.s32.totalorder %s2630_s25, 1 }
   0x9   : > { %p3092_p4 = por %p174_p2, %p173_p1  ;;  %s158_s29 = ssub.s32 %s3010_s22, %s5080_s26 }
   0xa   : > { %p2634_p6 = scmp.ge.s32.totalorder %s3014_s23, 1  ;;  %p161_p7 = scmp.eq.s32.totalorder %s158_s29, 0 }
   0xb   : > { %p3099_p8 = por %p180_p5, %p179_p3  ;;  %p239_p9 = scmp.lt.s32.totalorder %s3014_s23, 3 }
   0xc   : > { %s3105_s6 = scalar_select %p161_p7, %s3002_s20, %s163_s27  }
   0xd   : > { %p240_p10 = pnand %p2634_p6, %p239_p9 }
   0xf   : > { %243 = sbr.rel (%p240_p10) target bundleno = 725 (0x2d5), region = 40 }
  0x16   : > { %v2900_v0 = vld [vmem:[%s4710_s3] sm:$0xff]   ;;  %v3016_v1 = vmov 2   ;;  %v2901_v2 = vld [vmem:[%s4710_s3 + $0x8] sm:$0xff]   ;;  %p286_p11 = scmp.lt.s32.totalorder %s3006_s21, 1  ;;  %v2902_v3 = vld [vmem:[%s4710_s3 + $0x10] sm:$0xff]   ;;  %vm569_vm0 = vcmask 523264  }
  0x17   : > { %2895 = vset.pattern.permute.xlu1 %v3016_v1  ;;  %2894 = vset.pattern.permute.xlu0 %v3016_v1  ;;  %v2903_v8 = vld [vmem:[%s4710_s3 + $0x18] sm:$0xff]   ;;  %s2717_s9 = sshll.u32 %s3006_s21, 13 }
  0x18   : > { %2754 = vmatprep.subr.bf16.mxu0 %v2900_v0  ;;  %2826 = vmatprep.subr.bf16.mxu1 %v2900_v0  ;;  %s287_s11 = scalar_select %p286_p11, %s3006_s21, 1 }
  0x19   : > { %2755 = vmatpush3.bf16.msra.mxu0 %v2900_v0  ;;  %2830 = vmatpush3.bf16.msra.mxu1 %v2900_v0  ;;  %s3019_s21 = smov [#allocation2]  }
  0x1a   : > { %2756 = vmatprep.subr.bf16.mxu0 %v2901_v2  ;;  %2827 = vmatprep.subr.bf16.mxu1 %v2901_v2  ;;  %s2716_s12 = sshll.u32 %s287_s11, 9  ;;  %s2715_s15 = sshll.u32 %s287_s11, 8 }
  0x1b   : > { %s3121_s24 = scalar_lea.vmem %s4708_s1, %s2716_s12  ;;  %s3126_s29 = scalar_lea.vmem %s4707_s0, %s2715_s15 }
  0x1c   : > { %v3129_v4 = vld [vmem:[%s3121_s24 + $0x10] sm:$0xff]  ;;  %v3132_v5 = vld [vmem:[%s3121_s24] sm:$0xff]  ;;  %v3137_v6 = vld [vmem:[%s3121_s24 + $0x18] sm:$0xff]  ;;  %s282_s11 = sand.u32 1, %s2998_s19  }
  0x1d   : > { %2757 = vmatpush3.bf16.msra.mxu0 %v2901_v2  ;;  %2831 = vmatpush3.bf16.msra.mxu1 %v2901_v2  ;;  %v3140_v7 = vld [vmem:[%s3121_s24 + $0x8] sm:$0xff]  ;;  %v2904_v9 = vld [vmem:[%s3126_s29] sm:$0xff]   ;;  %v2908_v15 = vld [vmem:[%s3126_s29 + $0x10] sm:$0xff]   ;;  %s2635_s14 = sshll.u32 %s282_s11, 9  ;;  %s4661_s15 = scalar_lea.sflag [#allocation3], %s282_s11 }
  0x1e   : > { %1031 = vperm.xlu1 %2895, %v3129_v4   ;;  %1021 = vperm.xlu0 %2894, %v3132_v5   ;;  %v2905_v10 = vld [vmem:[%s3126_s29 + $0x80] sm:$0xff]   ;;  %v3150_v11 = vld [vmem:[%s3121_s24 + $0x28] sm:$0xff]  ;;  %v3163_v16 = vld [vmem:[%s3121_s24 + $0x38] sm:$0xff]  ;;  %s4572_s17 = scalar_lea.vmem [#allocation2], %s2635_s14  ;;  %s4654_s14 = scalar_lea.hbm %s4712_s5, %s2717_s9 }
  0x1f   : > { %2758 = vmatprep.subr.bf16.mxu0 %v2902_v3  ;;  %2828 = vmatprep.subr.bf16.mxu1 %v2902_v3  ;;  %v3153_v12 = vld [vmem:[%s3121_s24 + $0x20] sm:$0xff]  ;;  %v2906_v13 = vld [vmem:[%s3126_s29 + $0x8] sm:$0xff]   ;;  %v2909_v17 = vld [vmem:[%s3126_s29 + $0x90] sm:$0xff]   ;;  %s2517_s10 = sshll.u32 %s4572_s17, 4  ;;  %s4656_s10 = int_to_ptr.vmem [resolvable:$true] %s2517_s10 }
  0x20   : > { %2762 = vmatprep.mubr.msk.bf16.mxu0 %vm569_vm0, %v2904_v9  ;;  %2794 = vmatprep.mubr.msk.bf16.mxu1 %vm569_vm0, %v2905_v10  ;;  %v2907_v14 = vld [vmem:[%s3126_s29 + $0x88] sm:$0xff]   ;;  %v3167_v18 = vld [vmem:[%s3121_s24 + $0x30] sm:$0xff]  ;;  %v3179_v20 = vld [vmem:[%s3121_s24 + $0x40] sm:$0xff]  ;;  %s2936_s16 = scalar_lea.vmem %s4656_s10, 8192 }
  0x21   : > { %2759 = vmatpush3.bf16.msra.mxu0 %v2902_v3  ;;  %2832 = vmatpush3.bf16.msra.mxu1 %v2902_v3  ;;  %v3172_v19 = vld [vmem:[%s3121_s24 + $0x48] sm:$0xff]  ;;  %v2910_v21 = vld [vmem:[%s3126_s29 + $0x18] sm:$0xff]   ;;  %v2912_v23 = vld [vmem:[%s3126_s29 + $0x20] sm:$0xff]   ;;  %p2937_p12 = scmp.ne.s32.totalorder %s4656_s10, %s2936_s16 }
  0x22   : > { %1036 = vperm.xlu1 %2895, %v3137_v6   ;;  %1026 = vperm.xlu0 %2894, %v3140_v7   ;;  %v2911_v22 = vld [vmem:[%s3126_s29 + $0x98] sm:$0xff]   ;;  %v2913_v24 = vld [vmem:[%s3126_s29 + $0xa0] sm:$0xff]   ;;  %v3191_v26 = vld [vmem:[%s3121_s24 + $0x50] sm:$0xff] }
  0x23   : > { %2760 = vmatprep.subr.bf16.mxu0 %v2903_v8  ;;  %2829 = vmatprep.subr.bf16.mxu1 %v2903_v8  ;;  %v3188_v25 = vld [vmem:[%s3121_s24 + $0x58] sm:$0xff]  ;;  %v3196_v27 = vld [vmem:[%s3121_s24 + $0x68] sm:$0xff]  ;;  %v3203_v28 = vld [vmem:[%s3121_s24 + $0x60] sm:$0xff]  ;;  %p2938_p13 = pnand %p2937_p12, %p3092_p4 }
  0x24   : > { %v2914_v29 = vld [vmem:[%s3126_s29 + $0x28] sm:$0xff]   ;;  %v2916_v31 = vld [vmem:[%s3126_s29 + $0x30] sm:$0xff]   ;;  %v3212_v33 = vld [vmem:[%s3121_s24 + $0x78] sm:$0xff] }
  0x25   : > { %2761 = vmatpush3.bf16.msra.mxu0 %v2903_v8  ;;  %2833 = vmatpush3.bf16.msra.mxu1 %v2903_v8  ;;  %v2915_v30 = vld [vmem:[%s3126_s29 + $0xa8] sm:$0xff]   ;;  %v2917_v32 = vld [vmem:[%s3126_s29 + $0xb0] sm:$0xff]   ;;  %v3227_v36 = vld [vmem:[%s3121_s24 + $0x80] sm:$0xff]  ;;  %p2939_p0 = pneg %p2938_p13 }
  0x26   : > { %1046 = vperm.xlu1 %2895, %v3150_v11   ;;  %1041 = vperm.xlu0 %2894, %v3153_v12   ;;  %v3215_v34 = vld [vmem:[%s3121_s24 + $0x70] sm:$0xff]  ;;  %v3220_v35 = vld [vmem:[%s3121_s24 + $0x88] sm:$0xff]  ;;  %v2918_v37 = vld [vmem:[%s3126_s29 + $0x38] sm:$0xff]  }
  0x27   : > { %v2919_v38 = vld [vmem:[%s3126_s29 + $0xb8] sm:$0xff]   ;;  %v2920_v39 = vld [vmem:[%s3126_s29 + $0x40] sm:$0xff]   ;;  %v3239_v42 = vld [vmem:[%s3121_s24 + $0x90] sm:$0xff] }
  0x28   : > { %2763 = vmatmul.mubr.msk.bf16.vlgmr.msra.gmra.mrb[0].mxu0 %vm569_vm0, %v2906_v13  ;;  %2795 = vmatmul.mubr.msk.bf16.vlgmr.msra.gmra.mrb[0].mxu1 %vm569_vm0, %v2907_v14  ;;  %v2921_v40 = vld [vmem:[%s3126_s29 + $0xc0] sm:$0xff]   ;;  %v3236_v41 = vld [vmem:[%s3121_s24 + $0x98] sm:$0xff]  ;;  %v3244_v43 = vld [vmem:[%s3121_s24 + $0xa8] sm:$0xff] }
  0x29   : > { %2766 = vmatprep.mubr.msk.bf16.mxu0 %vm569_vm0, %v2908_v15  ;;  %2798 = vmatprep.mubr.msk.bf16.mxu1 %vm569_vm0, %v2909_v17  ;;  %v3251_v44 = vld [vmem:[%s3121_s24 + $0xa0] sm:$0xff]  ;;  %v2922_v45 = vld [vmem:[%s3126_s29 + $0x48] sm:$0xff]   ;;  %v2924_v47 = vld [vmem:[%s3126_s29 + $0x50] sm:$0xff]  }
  0x2a   : > { %1056 = vperm.xlu1 %2895, %v3163_v16   ;;  %1051 = vperm.xlu0 %2894, %v3167_v18   ;;  %v2923_v46 = vld [vmem:[%s3126_s29 + $0xc8] sm:$0xff]   ;;  %v2925_v48 = vld [vmem:[%s3126_s29 + $0xd0] sm:$0xff]   ;;  %v3260_v49 = vld [vmem:[%s3121_s24 + $0xb8] sm:$0xff] }
  0x2b   : > { %v3263_v50 = vld [vmem:[%s3121_s24 + $0xb0] sm:$0xff]  ;;  %v3272_v51 = vld [vmem:[%s3121_s24 + $0xc8] sm:$0xff]  ;;  %v3275_v52 = vld [vmem:[%s3121_s24 + $0xc0] sm:$0xff] }
  0x2c   : > { %v2926_v53 = vld [vmem:[%s3126_s29 + $0x58] sm:$0xff]   ;;  %v2928_v55 = vld [vmem:[%s3126_s29 + $0x60] sm:$0xff]   ;;  %v3287_v58 = vld [vmem:[%s3121_s24 + $0xd0] sm:$0xff] }
  0x2d   : > { %v2927_v54 = vld [vmem:[%s3126_s29 + $0xd8] sm:$0xff]   ;;  %v2929_v56 = vld [vmem:[%s3126_s29 + $0xe0] sm:$0xff]   ;;  %v3296_v59 = vld [vmem:[%s3121_s24 + $0xe8] sm:$0xff] }
  0x2e   : > { %1066 = vperm.xlu1 %2895, %v3172_v19   ;;  %1061 = vperm.xlu0 %2894, %v3179_v20   ;;  %v3284_v57 = vld [vmem:[%s3121_s24 + $0xd8] sm:$0xff]  ;;  %4751 = vst [vmem:[#allocation6_spill] sm:$0xff] %v3296_v59  ;;  %v3299_v60 = vld [vmem:[%s3121_s24 + $0xe0] sm:$0xff]  ;;  %v2930_v61 = vld [vmem:[%s3126_s29 + $0x68] sm:$0xff]  }
  0x2f   : > { %4750 = vst [vmem:[#allocation5_spill] sm:$0xff] %v3284_v57  ;;  %v2931_v62 = vld [vmem:[%s3126_s29 + $0xe8] sm:$0xff]   ;;  %v2932_v63 = vld [vmem:[%s3126_s29 + $0x70] sm:$0xff]   ;;  %v3308_v1 = vld [vmem:[%s3121_s24 + $0xf8] sm:$0xff] }
  0x30   : > { %2767 = vmatmul.mubr.msk.bf16.gmra.mrb[4].mxu0 %vm569_vm0, %v2910_v21  ;;  %2799 = vmatmul.mubr.msk.bf16.gmra.mrb[4].mxu1 %vm569_vm0, %v2911_v22  ;;  %v2933_v0 = vld [vmem:[%s3126_s29 + $0xf0] sm:$0xff]   ;;  %4752 = vst [vmem:[#allocation7_spill] sm:$0xff] %v3308_v1  ;;  %v3320_v3 = vld [vmem:[%s3121_s24 + $0x108] sm:$0xff]  ;;  %v3323_v8 = vld [vmem:[%s3121_s24 + $0x100] sm:$0xff] }
  0x31   : > { %2770 = vmatprep.mubr.msk.bf16.mxu0 %vm569_vm0, %v2912_v23  ;;  %2802 = vmatprep.mubr.msk.bf16.mxu1 %vm569_vm0, %v2913_v24  ;;  %v3311_v2 = vld [vmem:[%s3121_s24 + $0xf0] sm:$0xff]  ;;  %4753 = vst [vmem:[#allocation8_spill] sm:$0xff] %v3320_v3  ;;  %v2934_v9 = vld [vmem:[%s3126_s29 + $0x78] sm:$0xff]   ;;  %v3340_v15 = vld [vmem:[%s3121_s24 + $0x128] sm:$0xff] }
  0x32   : > { %1076 = vperm.xlu1 %2895, %v3188_v25   ;;  %1071 = vperm.xlu0 %2894, %v3191_v26   ;;  %v2935_v10 = vld [vmem:[%s3126_s29 + $0xf8] sm:$0xff]   ;;  %v3333_v14 = vld [vmem:[%s3121_s24 + $0x110] sm:$0xff]  ;;  %4755 = vst [vmem:[#allocation10_spill] sm:$0xff] %v3340_v15  ;;  %v3343_v17 = vld [vmem:[%s3121_s24 + $0x120] sm:$0xff] }
  0x33   : > { %v3330_v13 = vld [vmem:[%s3121_s24 + $0x118] sm:$0xff]  ;;  %v3351_v22 = vld [vmem:[%s3121_s24 + $0x130] sm:$0xff]  ;;  %v3356_v23 = vld [vmem:[%s3121_s24 + $0x148] sm:$0xff] }
  0x34   : > { %4754 = vst [vmem:[#allocation9_spill] sm:$0xff] %v3330_v13  ;;  %v3348_v21 = vld [vmem:[%s3121_s24 + $0x138] sm:$0xff]  ;;  %4757 = vst [vmem:[#allocation12_spill] sm:$0xff] %v3356_v23  ;;  %v3359_v24 = vld [vmem:[%s3121_s24 + $0x140] sm:$0xff] }
  0x35   : > { %4756 = vst [vmem:[#allocation11_spill] sm:$0xff] %v3348_v21 }
  0x36   : > { %1086 = vperm.xlu1 %2895, %v3196_v27   ;;  %1081 = vperm.xlu0 %2894, %v3203_v28  }
  0x38   : > { %2771 = vmatmul.mubr.msk.bf16.gmra.mrb[8].mxu0 %vm569_vm0, %v2914_v29  ;;  %2803 = vmatmul.mubr.msk.bf16.gmra.mrb[8].mxu1 %vm569_vm0, %v2915_v30  ;;  %v3364_v29 = vld [vmem:[%s3121_s24 + $0x158] sm:$0xff]  ;;  %v3367_v30 = vld [vmem:[%s3121_s24 + $0x150] sm:$0xff] }
  0x39   : > { %2774 = vmatprep.mubr.msk.bf16.mxu0 %vm569_vm0, %v2916_v31  ;;  %2806 = vmatprep.mubr.msk.bf16.mxu1 %vm569_vm0, %v2917_v32  ;;  %4758 = vst [vmem:[#allocation13_spill] sm:$0xff] %v3364_v29  ;;  %v3372_v31 = vld [vmem:[%s3121_s24 + $0x168] sm:$0xff]  ;;  %v3375_v32 = vld [vmem:[%s3121_s24 + $0x160] sm:$0xff] }
  0x3a   : > { %1096 = vperm.xlu1 %2895, %v3212_v33   ;;  %1091 = vperm.xlu0 %2894, %v3215_v34   ;;  %4759 = vst [vmem:[#allocation14_spill] sm:$0xff] %v3372_v31  ;;  %4760 = vst [vmem:[#allocation15_spill] sm:$0xff] %v3375_v32 }
  0x3e   : > { %1106 = vperm.xlu1 %2895, %v3220_v35   ;;  %1101 = vperm.xlu0 %2894, %v3227_v36  }
  0x40   : > { %2775 = vmatmul.mubr.msk.bf16.gmra.mrb[12].mxu0 %vm569_vm0, %v2918_v37  ;;  %2807 = vmatmul.mubr.msk.bf16.gmra.mrb[12].mxu1 %vm569_vm0, %v2919_v38  ;;  %v3380_v37 = vld [vmem:[%s3121_s24 + $0x178] sm:$0xff]  ;;  %v3383_v38 = vld [vmem:[%s3121_s24 + $0x170] sm:$0xff] }
  0x41   : > { %2778 = vmatprep.mubr.msk.bf16.mxu0 %vm569_vm0, %v2920_v39  ;;  %2810 = vmatprep.mubr.msk.bf16.mxu1 %vm569_vm0, %v2921_v40  ;;  %4761 = vst [vmem:[#allocation16_spill] sm:$0xff] %v3380_v37  ;;  %4762 = vst [vmem:[#allocation17_spill] sm:$0xff] %v3383_v38  ;;  %v3388_v39 = vld [vmem:[%s3121_s24 + $0x188] sm:$0xff]  ;;  %v3391_v40 = vld [vmem:[%s3121_s24 + $0x180] sm:$0xff] }
  0x42   : > { %1116 = vperm.xlu1 %2895, %v3236_v41   ;;  %1111 = vperm.xlu0 %2894, %v3239_v42   ;;  %4763 = vst [vmem:[#allocation18_spill] sm:$0xff] %v3388_v39  ;;  %4764 = vst [vmem:[#allocation19_spill] sm:$0xff] %v3391_v40 }
  0x46   : > { %1126 = vperm.xlu1 %2895, %v3244_v43   ;;  %1121 = vperm.xlu0 %2894, %v3251_v44  }
  0x48   : > { %2779 = vmatmul.mubr.msk.bf16.gmra.mrb[16].mxu0 %vm569_vm0, %v2922_v45  ;;  %2811 = vmatmul.mubr.msk.bf16.gmra.mrb[16].mxu1 %vm569_vm0, %v2923_v46  ;;  %v3396_v45 = vld [vmem:[%s3121_s24 + $0x198] sm:$0xff]  ;;  %v3399_v46 = vld [vmem:[%s3121_s24 + $0x190] sm:$0xff] }
  0x49   : > { %2782 = vmatprep.mubr.msk.bf16.mxu0 %vm569_vm0, %v2924_v47  ;;  %2814 = vmatprep.mubr.msk.bf16.mxu1 %vm569_vm0, %v2925_v48  ;;  %4765 = vst [vmem:[#allocation20_spill] sm:$0xff] %v3396_v45  ;;  %4766 = vst [vmem:[#allocation21_spill] sm:$0xff] %v3399_v46  ;;  %v3404_v47 = vld [vmem:[%s3121_s24 + $0x1a8] sm:$0xff]  ;;  %v3407_v48 = vld [vmem:[%s3121_s24 + $0x1a0] sm:$0xff] }
  0x4a   : > { %1136 = vperm.xlu1 %2895, %v3260_v49   ;;  %1131 = vperm.xlu0 %2894, %v3263_v50   ;;  %4767 = vst [vmem:[#allocation22_spill] sm:$0xff] %v3404_v47  ;;  %4768 = vst [vmem:[#allocation23_spill] sm:$0xff] %v3407_v48 }
  0x4e   : > { %1146 = vperm.xlu1 %2895, %v3272_v51   ;;  %1141 = vperm.xlu0 %2894, %v3275_v52  }
  0x50   : > { %2783 = vmatmul.mubr.msk.bf16.gmra.mrb[20].mxu0 %vm569_vm0, %v2926_v53  ;;  %2815 = vmatmul.mubr.msk.bf16.gmra.mrb[20].mxu1 %vm569_vm0, %v2927_v54  ;;  %v3412_v53 = vld [vmem:[%s3121_s24 + $0x1b8] sm:$0xff]  ;;  %v3415_v54 = vld [vmem:[%s3121_s24 + $0x1b0] sm:$0xff] }
  0x51   : > { %2786 = vmatprep.mubr.msk.bf16.mxu0 %vm569_vm0, %v2928_v55  ;;  %2818 = vmatprep.mubr.msk.bf16.mxu1 %vm569_vm0, %v2929_v56  ;;  %4769 = vst [vmem:[#allocation24_spill] sm:$0xff] %v3412_v53  ;;  %4770 = vst [vmem:[#allocation25_spill] sm:$0xff] %v3415_v54  ;;  %v3420_v55 = vld [vmem:[%s3121_s24 + $0x1c8] sm:$0xff]  ;;  %v3423_v56 = vld [vmem:[%s3121_s24 + $0x1c0] sm:$0xff] }
  0x52   : > { %1156 = vperm.xlu1 %2895, %v3284_v57   ;;  %1151 = vperm.xlu0 %2894, %v3287_v58   ;;  %4771 = vst [vmem:[#allocation26_spill] sm:$0xff] %v3420_v55  ;;  %4772 = vst [vmem:[#allocation27_spill] sm:$0xff] %v3423_v56 }
  0x56   : > { %1166 = vperm.xlu1 %2895, %v3296_v59   ;;  %1161 = vperm.xlu0 %2894, %v3299_v60  }
  0x58   : > { %2787 = vmatmul.mubr.msk.bf16.gmra.mrb[24].mxu0 %vm569_vm0, %v2930_v61  ;;  %2819 = vmatmul.mubr.msk.bf16.gmra.mrb[24].mxu1 %vm569_vm0, %v2931_v62  ;;  %v3428_v61 = vld [vmem:[%s3121_s24 + $0x1d8] sm:$0xff]  ;;  %v3431_v62 = vld [vmem:[%s3121_s24 + $0x1d0] sm:$0xff] }
  0x59   : > { %2790 = vmatprep.mubr.msk.bf16.mxu0 %vm569_vm0, %v2932_v63  ;;  %2822 = vmatprep.mubr.msk.bf16.mxu1 %vm569_vm0, %v2933_v0  ;;  %4773 = vst [vmem:[#allocation28_spill] sm:$0xff] %v3428_v61  ;;  %4774 = vst [vmem:[#allocation29_spill] sm:$0xff] %v3431_v62  ;;  %v3436_v63 = vld [vmem:[%s3121_s24 + $0x1e8] sm:$0xff]  ;;  %v3439_v0 = vld [vmem:[%s3121_s24 + $0x1e0] sm:$0xff] }
  0x5a   : > { %1176 = vperm.xlu1 %2895, %v3308_v1   ;;  %1171 = vperm.xlu0 %2894, %v3311_v2   ;;  %4775 = vst [vmem:[#allocation30_spill] sm:$0xff] %v3436_v63  ;;  %4776 = vst [vmem:[#allocation31_spill] sm:$0xff] %v3439_v0 }
  0x5e   : > { %1186 = vperm.xlu1 %2895, %v3320_v3   ;;  %1181 = vperm.xlu0 %2894, %v3323_v8  }
  0x60   : > { %2791 = vmatmul.mubr.msk.bf16.gmra.mrb[28].mxu0 %vm569_vm0, %v2934_v9  ;;  %2823 = vmatmul.mubr.msk.bf16.gmra.mrb[28].mxu1 %vm569_vm0, %v2935_v10  ;;  %v3444_v9 = vld [vmem:[%s3121_s24 + $0x1f8] sm:$0xff]  ;;  %v3447_v10 = vld [vmem:[%s3121_s24 + $0x1f0] sm:$0xff]  ;;  %s2940_s24 = sshll.u32 %s3019_s21, 4  ;;  %s2941_s24 = int_to_ptr.vmem [resolvable:$false] %s2940_s24 }
  0x61   : > { %4777 = vst [vmem:[#allocation32_spill] sm:$0xff] %v3444_v9  ;;  %4778 = vst [vmem:[#allocation33_spill] sm:$0xff] %v3447_v10  ;;  %s2942_s25 = scalar_lea.vmem %s2941_s24, 16384  ;;  %p2943_p1 = scmp.lt.s32.totalorder %s4656_s10, %s2941_s24 }
  0x62   : > { %1196 = vperm.xlu1 %2895, %v3330_v13   ;;  %1191 = vperm.xlu0 %2894, %v3333_v14   ;;  %p2944_p2 = scmp.lt.s32.totalorder %s2942_s25, %s2936_s16 }
  0x64   : > { %p2945_p3 = por %p2944_p2, %p2943_p1 }
  0x66   : > { %1206 = vperm.xlu1 %2895, %v3340_v15   ;;  %1201 = vperm.xlu0 %2894, %v3343_v17   ;;  %p2946_p5 = pnand %p2945_p3, %p2939_p0 }
  0x6a   : > { %1216 = vperm.xlu1 %2895, %v3348_v21   ;;  %1211 = vperm.xlu0 %2894, %v3351_v22  }
  0x6e   : > { %1226 = vperm.xlu1 %2895, %v3356_v23   ;;  %1221 = vperm.xlu0 %2894, %v3359_v24  }
  0x72   : > { %1236 = vperm.xlu1 %2895, %v3364_v29   ;;  %1231 = vperm.xlu0 %2894, %v3367_v30  }
  0x76   : > { %1246 = vperm.xlu1 %2895, %v3372_v31   ;;  %1241 = vperm.xlu0 %2894, %v3375_v32  }
  0x7a   : > { %1256 = vperm.xlu1 %2895, %v3380_v37   ;;  %1251 = vperm.xlu0 %2894, %v3383_v38  }
  0x7e   : > { %1266 = vperm.xlu1 %2895, %v3388_v39   ;;  %1261 = vperm.xlu0 %2894, %v3391_v40  }
  0x82   : > { %1276 = vperm.xlu1 %2895, %v3396_v45   ;;  %1271 = vperm.xlu0 %2894, %v3399_v46  }
  0x86   : > { %1286 = vperm.xlu1 %2895, %v3404_v47   ;;  %1281 = vperm.xlu0 %2894, %v3407_v48  }
  0x8a   : > { %1296 = vperm.xlu1 %2895, %v3412_v53   ;;  %1291 = vperm.xlu0 %2894, %v3415_v54  }
  0x8e   : > { %1306 = vperm.xlu1 %2895, %v3420_v55   ;;  %1301 = vperm.xlu0 %2894, %v3423_v56  }
  0x92   : > { %1316 = vperm.xlu1 %2895, %v3428_v61   ;;  %1311 = vperm.xlu0 %2894, %v3431_v62   ;;  %v3017_v62 = vmov 0  }
  0x96   : > { %1326 = vperm.xlu1 %2895, %v3436_v63   ;;  %1321 = vperm.xlu0 %2894, %v3439_v0  }
  0x9a   : > { %1336 = vperm.xlu1 %2895, %v3444_v9   ;;  %1331 = vperm.xlu0 %2894, %v3447_v10  }
  0x9d   : > { %v3451_v55 = vpop.permute.xlu1 %1031  ;;  %v3453_v61 = vpop.permute.xlu0 %1021 }
  0x9e   : > { %4779 = vst [vmem:[#allocation34_spill] sm:$0xff] %v3451_v55  ;;  %4780 = vst [vmem:[#allocation35_spill] sm:$0xff] %v3453_v61  ;;  %2897 = vset.pattern.permute.xlu1 %v3017_v62  ;;  %2896 = vset.pattern.permute.xlu0 %v3017_v62 }
  0x9f   : > { %1409 = vperm.xlu1 %2897, %v3140_v7   ;;  %1405 = vperm.xlu0 %2896, %v3132_v5  }
  0xa1   : > { %v3457_v63 = vpop.permute.xlu1 %1036  ;;  %v3459_v0 = vpop.permute.xlu0 %1026 }
  0xa2   : > { %4781 = vst [vmem:[#allocation36_spill] sm:$0xff] %v3457_v63  ;;  %4782 = vst [vmem:[#allocation37_spill] sm:$0xff] %v3459_v0 }
  0xa3   : > { %1413 = vperm.xlu1 %2897, %v3129_v4   ;;  %1417 = vperm.xlu0 %2896, %v3137_v6  }
  0xa5   : > { %v3463_v9 = vpop.permute.xlu1 %1046  ;;  %v3465_v55 = vpop.permute.xlu0 %1041 }
  0xa6   : > { %4783 = vst [vmem:[#allocation38_spill] sm:$0xff] %v3463_v9  ;;  %4784 = vst [vmem:[#allocation39_spill] sm:$0xff] %v3465_v55 }
  0xa7   : > { %1421 = vperm.xlu1 %2897, %v3153_v12   ;;  %1425 = vperm.xlu0 %2896, %v3150_v11  }
  0xa9   : > { %v3469_v62 = vpop.permute.xlu1 %1056  ;;  %v3471_v61 = vpop.permute.xlu0 %1051 }
  0xaa   : > { %4785 = vst [vmem:[#allocation40_spill] sm:$0xff] %v3469_v62  ;;  %4786 = vst [vmem:[#allocation41_spill] sm:$0xff] %v3471_v61 }
  0xab   : > { %1429 = vperm.xlu1 %2897, %v3167_v18   ;;  %1433 = vperm.xlu0 %2896, %v3163_v16  }
  0xad   : > { %v3475_v63 = vpop.permute.xlu1 %1066  ;;  %v3477_v0 = vpop.permute.xlu0 %1061 }
  0xae   : > { %4787 = vst [vmem:[#allocation42_spill] sm:$0xff] %v3475_v63  ;;  %4788 = vst [vmem:[#allocation43_spill] sm:$0xff] %v3477_v0 }
  0xaf   : > { %1437 = vperm.xlu1 %2897, %v3179_v20   ;;  %1441 = vperm.xlu0 %2896, %v3172_v19  }
  0xb1   : > { %v3481_v9 = vpop.permute.xlu1 %1076  ;;  %v3483_v55 = vpop.permute.xlu0 %1071 }
  0xb2   : > { %4789 = vst [vmem:[#allocation44_spill] sm:$0xff] %v3481_v9  ;;  %4790 = vst [vmem:[#allocation45_spill] sm:$0xff] %v3483_v55 }
  0xb3   : > { %1445 = vperm.xlu1 %2897, %v3191_v26   ;;  %1449 = vperm.xlu0 %2896, %v3188_v25  }
  0xb5   : > { %v3487_v62 = vpop.permute.xlu1 %1086  ;;  %v3489_v61 = vpop.permute.xlu0 %1081 }
  0xb6   : > { %4791 = vst [vmem:[#allocation46_spill] sm:$0xff] %v3487_v62  ;;  %4792 = vst [vmem:[#allocation47_spill] sm:$0xff] %v3489_v61 }
  0xb7   : > { %1453 = vperm.xlu1 %2897, %v3203_v28   ;;  %1457 = vperm.xlu0 %2896, %v3196_v27  }
  0xb9   : > { %v3493_v63 = vpop.permute.xlu1 %1096  ;;  %v3495_v0 = vpop.permute.xlu0 %1091 }
  0xba   : > { %4793 = vst [vmem:[#allocation48_spill] sm:$0xff] %v3493_v63  ;;  %4794 = vst [vmem:[#allocation49_spill] sm:$0xff] %v3495_v0 }
  0xbb   : > { %1461 = vperm.xlu1 %2897, %v3215_v34   ;;  %1465 = vperm.xlu0 %2896, %v3212_v33  }
  0xbd   : > { %v3499_v9 = vpop.permute.xlu1 %1106  ;;  %v3501_v55 = vpop.permute.xlu0 %1101 }
  0xbe   : > { %4795 = vst [vmem:[#allocation50_spill] sm:$0xff] %v3499_v9  ;;  %4796 = vst [vmem:[#allocation51_spill] sm:$0xff] %v3501_v55 }
  0xbf   : > { %1469 = vperm.xlu1 %2897, %v3227_v36   ;;  %1473 = vperm.xlu0 %2896, %v3220_v35  }
  0xc1   : > { %v3505_v62 = vpop.permute.xlu1 %1116  ;;  %v3507_v61 = vpop.permute.xlu0 %1111 }
  0xc2   : > { %4797 = vst [vmem:[#allocation52_spill] sm:$0xff] %v3505_v62  ;;  %4798 = vst [vmem:[#allocation53_spill] sm:$0xff] %v3507_v61 }
  0xc3   : > { %1477 = vperm.xlu1 %2897, %v3239_v42   ;;  %1481 = vperm.xlu0 %2896, %v3236_v41  }
  0xc5   : > { %v3511_v63 = vpop.permute.xlu1 %1126  ;;  %v3513_v0 = vpop.permute.xlu0 %1121 }
  0xc6   : > { %4799 = vst [vmem:[#allocation54_spill] sm:$0xff] %v3511_v63  ;;  %4800 = vst [vmem:[#allocation55_spill] sm:$0xff] %v3513_v0 }
  0xc7   : > { %1485 = vperm.xlu1 %2897, %v3251_v44   ;;  %1489 = vperm.xlu0 %2896, %v3244_v43  }
  0xc9   : > { %v3517_v9 = vpop.permute.xlu1 %1136  ;;  %v3519_v55 = vpop.permute.xlu0 %1131 }
  0xca   : > { %4801 = vst [vmem:[#allocation56_spill] sm:$0xff] %v3517_v9  ;;  %4802 = vst [vmem:[#allocation57_spill] sm:$0xff] %v3519_v55 }
  0xcb   : > { %1493 = vperm.xlu1 %2897, %v3263_v50   ;;  %1497 = vperm.xlu0 %2896, %v3260_v49  }
  0xcd   : > { %v3523_v62 = vpop.permute.xlu1 %1146  ;;  %v3525_v61 = vpop.permute.xlu0 %1141 }
  0xce   : > { %4803 = vst [vmem:[#allocation58_spill] sm:$0xff] %v3523_v62  ;;  %4804 = vst [vmem:[#allocation59_spill] sm:$0xff] %v3525_v61 }
  0xcf   : > { %1501 = vperm.xlu1 %2897, %v3275_v52   ;;  %1505 = vperm.xlu0 %2896, %v3272_v51  }
  0xd1   : > { %v3529_v63 = vpop.permute.xlu1 %1156  ;;  %v3531_v0 = vpop.permute.xlu0 %1151 }
  0xd2   : > { %4805 = vst [vmem:[#allocation60_spill] sm:$0xff] %v3529_v63  ;;  %4806 = vst [vmem:[#allocation61_spill] sm:$0xff] %v3531_v0 }
  0xd3   : > { %1509 = vperm.xlu1 %2897, %v3287_v58   ;;  %1513 = vperm.xlu0 %2896, %v3284_v57  }
  0xd5   : > { %v3535_v9 = vpop.permute.xlu1 %1166  ;;  %v3537_v55 = vpop.permute.xlu0 %1161 }
  0xd6   : > { %4807 = vst [vmem:[#allocation62_spill] sm:$0xff] %v3537_v55 }
  0xd7   : > { %1517 = vperm.xlu1 %2897, %v3299_v60   ;;  %1521 = vperm.xlu0 %2896, %v3296_v59  }
  0xd9   : > { %v3541_v62 = vpop.permute.xlu1 %1176  ;;  %v3543_v61 = vpop.permute.xlu0 %1171 }
  0xda   : > { %4808 = vst [vmem:[#allocation63_spill] sm:$0xff] %v3543_v61 }
  0xdb   : > { %1525 = vperm.xlu1 %2897, %v3311_v2   ;;  %1529 = vperm.xlu0 %2896, %v3308_v1  }
  0xdd   : > { %v3547_v63 = vpop.permute.xlu1 %1186  ;;  %v3549_v0 = vpop.permute.xlu0 %1181 }
  0xde   : > { %4809 = vst [vmem:[#allocation64_spill] sm:$0xff] %v3547_v63 }
  0xdf   : > { %1533 = vperm.xlu1 %2897, %v3323_v8   ;;  %1537 = vperm.xlu0 %2896, %v3320_v3  }
  0xe1   : > { %v3553_v55 = vpop.permute.xlu1 %1196  ;;  %v3555_v57 = vpop.permute.xlu0 %1191 }
  0xe2   : > { %4810 = vst [vmem:[#allocation65_spill] sm:$0xff] %v3553_v55 }
  0xe3   : > { %1541 = vperm.xlu1 %2897, %v3333_v14   ;;  %1545 = vperm.xlu0 %2896, %v3330_v13  }
  0xe5   : > { %v3559_v61 = vpop.permute.xlu1 %1206  ;;  %v3561_v59 = vpop.permute.xlu0 %1201 }
  0xe6   : > { %4811 = vst [vmem:[#allocation66_spill] sm:$0xff] %v3559_v61 }
  0xe7   : > { %1549 = vperm.xlu1 %2897, %v3343_v17   ;;  %1553 = vperm.xlu0 %2896, %v3340_v15  }
  0xe9   : > { %v3565_v1 = vpop.permute.xlu1 %1216  ;;  %v3567_v63 = vpop.permute.xlu0 %1211 }
  0xea   : > { %4812 = vst [vmem:[#allocation67_spill] sm:$0xff] %v3565_v1 }
  0xeb   : > { %1557 = vperm.xlu1 %2897, %v3351_v22   ;;  %1561 = vperm.xlu0 %2896, %v3348_v21  }
  0xed   : > { %v3571_v3 = vpop.permute.xlu1 %1226  ;;  %v3573_v55 = vpop.permute.xlu0 %1221 }
  0xee   : > { %4813 = vst [vmem:[#allocation68_spill] sm:$0xff] %v3571_v3 }
  0xef   : > { %1565 = vperm.xlu1 %2897, %v3359_v24   ;;  %1569 = vperm.xlu0 %2896, %v3356_v23  }
  0xf1   : > { %v3577_v13 = vpop.permute.xlu1 %1236  ;;  %v3579_v61 = vpop.permute.xlu0 %1231 }
  0xf2   : > { %4814 = vst [vmem:[#allocation69_spill] sm:$0xff] %v3577_v13  ;;  %4815 = vst [vmem:[#allocation70_spill] sm:$0xff] %v3579_v61 }
  0xf3   : > { %1573 = vperm.xlu1 %2897, %v3367_v30   ;;  %1577 = vperm.xlu0 %2896, %v3364_v29  }
  0xf5   : > { %v3583_v15 = vpop.permute.xlu1 %1246  ;;  %v3585_v1 = vpop.permute.xlu0 %1241 }
  0xf6   : > { %4816 = vst [vmem:[#allocation71_spill] sm:$0xff] %v3583_v15  ;;  %4817 = vst [vmem:[#allocation72_spill] sm:$0xff] %v3585_v1 }
  0xf7   : > { %1581 = vperm.xlu1 %2897, %v3375_v32   ;;  %1585 = vperm.xlu0 %2896, %v3372_v31  }
  0xf9   : > { %v3589_v21 = vpop.permute.xlu1 %1256  ;;  %v3591_v3 = vpop.permute.xlu0 %1251 }
  0xfa   : > { %4818 = vst [vmem:[#allocation73_spill] sm:$0xff] %v3589_v21  ;;  %4819 = vst [vmem:[#allocation74_spill] sm:$0xff] %v3591_v3 }
  0xfb   : > { %1589 = vperm.xlu1 %2897, %v3383_v38   ;;  %1593 = vperm.xlu0 %2896, %v3380_v37   ;;  %v3595_v23 = vpop.f32.mrb[0].mxu0  ;;  %v3597_v13 = vpop.f32.mrb[0].mxu1 }
  0xfc   : > { %4820 = vst [vmem:[#allocation75_spill] sm:$0xff] %v3595_v23  ;;  %v3599_v29 = vpop.f32.mrb[1].mxu0  ;;  %v3601_v15 = vpop.f32.mrb[1].mxu1 }
  0xfd   : > { %4821 = vst [vmem:[#allocation76_spill] sm:$0xff] %v3599_v29  ;;  %v3603_v1 = vpop.permute.xlu1 %1266  ;;  %v3605_v32 = vpop.permute.xlu0 %1261 }
  0xfe   : > { %4822 = vst [vmem:[#allocation77_spill] sm:$0xff] %v3603_v1  ;;  %4823 = vst [vmem:[#allocation78_spill] sm:$0xff] %v3605_v32  ;;  %v3607_v31 = vpop.f32.mrb[2].mxu0  ;;  %v3609_v21 = vpop.f32.mrb[2].mxu1 }
  0xff   : > { %4824 = vst [vmem:[#allocation79_spill] sm:$0xff] %v3607_v31  ;;  %1597 = vperm.xlu1 %2897, %v3391_v40   ;;  %1601 = vperm.xlu0 %2896, %v3388_v39   ;;  %v3613_v37 = vpop.f32.mrb[3].mxu0  ;;  %v3615_v23 = vpop.f32.mrb[3].mxu1 }
 0x100   : > { %4825 = vst [vmem:[#allocation80_spill] sm:$0xff] %v3613_v37 }
 0x101   : > { %v3617_v3 = vpop.permute.xlu1 %1276  ;;  %v3619_v29 = vpop.permute.xlu0 %1271 }
 0x102   : > { %4826 = vst [vmem:[#allocation81_spill] sm:$0xff] %v3617_v3  ;;  %4827 = vst [vmem:[#allocation82_spill] sm:$0xff] %v3619_v29 }
 0x103   : > { %1605 = vperm.xlu1 %2897, %v3399_v46   ;;  %1609 = vperm.xlu0 %2896, %v3396_v45   ;;  %v3623_v1 = vpop.f32.mrb[4].mxu0  ;;  %v3625_v31 = vpop.f32.mrb[4].mxu1 }
 0x104   : > { %4828 = vst [vmem:[#allocation83_spill] sm:$0xff] %v3623_v1  ;;  %v3627_v32 = vpop.f32.mrb[5].mxu0  ;;  %v3629_v40 = vpop.f32.mrb[5].mxu1 }
 0x105   : > { %4829 = vst [vmem:[#allocation84_spill] sm:$0xff] %v3627_v32  ;;  %v3631_v39 = vpop.permute.xlu1 %1286  ;;  %v3633_v37 = vpop.permute.xlu0 %1281 }
 0x106   : > { %4830 = vst [vmem:[#allocation85_spill] sm:$0xff] %v3631_v39  ;;  %4831 = vst [vmem:[#allocation86_spill] sm:$0xff] %v3633_v37  ;;  %v3635_v38 = vpop.f32.mrb[6].mxu0  ;;  %v3637_v3 = vpop.f32.mrb[6].mxu1 }
 0x107   : > { %4832 = vst [vmem:[#allocation87_spill] sm:$0xff] %v3635_v38  ;;  %1613 = vperm.xlu1 %2897, %v3407_v48   ;;  %1617 = vperm.xlu0 %2896, %v3404_v47   ;;  %v3641_v45 = vpop.f32.mrb[7].mxu0  ;;  %v3643_v1 = vpop.f32.mrb[7].mxu1 }
 0x108   : > { %4833 = vst [vmem:[#allocation88_spill] sm:$0xff] %v3641_v45 }
 0x109   : > { %v3645_v29 = vpop.permute.xlu1 %1296  ;;  %v3647_v32 = vpop.permute.xlu0 %1291 }
 0x10a   : > { %4834 = vst [vmem:[#allocation89_spill] sm:$0xff] %v3645_v29  ;;  %4835 = vst [vmem:[#allocation90_spill] sm:$0xff] %v3647_v32  ;;  %v4843_v32 = vld [vmem:[#allocation26_spill] sm:$0xff] }
 0x10b   : > { %1621 = vperm.xlu1 %2897, %v3415_v54   ;;  %1625 = vperm.xlu0 %2896, %v3412_v53   ;;  %v3651_v39 = vpop.f32.mrb[8].mxu0  ;;  %v3653_v38 = vpop.f32.mrb[8].mxu1 }
 0x10c   : > { %4836 = vst [vmem:[#allocation91_spill] sm:$0xff] %v3651_v39  ;;  %4837 = vst [vmem:[#allocation92_spill] sm:$0xff] %v3653_v38  ;;  %v3655_v37 = vpop.f32.mrb[9].mxu0  ;;  %v3657_v48 = vpop.f32.mrb[9].mxu1  ;;  %v4847_v38 = vld [vmem:[#allocation29_spill] sm:$0xff] }
 0x10d   : > { %4838 = vst [vmem:[#allocation93_spill] sm:$0xff] %v3655_v37  ;;  %v3659_v47 = vpop.permute.xlu1 %1306  ;;  %v3661_v45 = vpop.permute.xlu0 %1301 }
 0x10e   : > { %4839 = vst [vmem:[#allocation94_spill] sm:$0xff] %v3659_v47  ;;  %4840 = vst [vmem:[#allocation95_spill] sm:$0xff] %v3661_v45  ;;  %v3663_v46 = vpop.f32.mrb[10].mxu0  ;;  %v3665_v29 = vpop.f32.mrb[10].mxu1  ;;  %v4848_v47 = vld [vmem:[#allocation28_spill] sm:$0xff] }
 0x10f   : > { %4841 = vst [vmem:[#allocation96_spill] sm:$0xff] %v3663_v46  ;;  %4842 = vst [vmem:[#allocation97_spill] sm:$0xff] %v3665_v29  ;;  %1629 = vperm.xlu1 %2897, %v3423_v56   ;;  %1633 = vperm.xlu0 %2896, %v4843_v32   ;;  %v3669_v53 = vpop.f32.mrb[11].mxu0  ;;  %v3671_v39 = vpop.f32.mrb[11].mxu1 }
 0x110   : > { %4844 = vst [vmem:[#allocation98_spill] sm:$0xff] %v3669_v53 }
 0x111   : > { %v3673_v54 = vpop.permute.xlu1 %1316  ;;  %v3675_v37 = vpop.permute.xlu0 %1311 }
 0x112   : > { %4845 = vst [vmem:[#allocation99_spill] sm:$0xff] %v3673_v54  ;;  %4846 = vst [vmem:[#allocation100_spill] sm:$0xff] %v3675_v37  ;;  %v4856_v37 = vld [vmem:[#allocation31_spill] sm:$0xff] }
 0x113   : > { %1637 = vperm.xlu1 %2897, %v4847_v38   ;;  %1641 = vperm.xlu0 %2896, %v4848_v47   ;;  %v3679_v45 = vpop.f32.mrb[12].mxu0  ;;  %v3681_v46 = vpop.f32.mrb[12].mxu1  ;;  %v4857_v38 = vld [vmem:[#allocation30_spill] sm:$0xff] }
 0x114   : > { %4849 = vst [vmem:[#allocation101_spill] sm:$0xff] %v3679_v45  ;;  %4850 = vst [vmem:[#allocation102_spill] sm:$0xff] %v3681_v46  ;;  %v3683_v29 = vpop.f32.mrb[13].mxu0  ;;  %v3685_v56 = vpop.f32.mrb[13].mxu1 }
 0x115   : > { %4851 = vst [vmem:[#allocation103_spill] sm:$0xff] %v3683_v29  ;;  %v3687_v32 = vpop.permute.xlu1 %1326  ;;  %v3689_v53 = vpop.permute.xlu0 %1321 }
 0x116   : > { %4852 = vst [vmem:[#allocation104_spill] sm:$0xff] %v3687_v32  ;;  %4853 = vst [vmem:[#allocation105_spill] sm:$0xff] %v3689_v53  ;;  %v3691_v61 = vpop.f32.mrb[14].mxu0  ;;  %v3693_v54 = vpop.f32.mrb[14].mxu1  ;;  %v4862_v32 = vld [vmem:[#allocation32_spill] sm:$0xff] }
 0x117   : > { %4854 = vst [vmem:[#allocation106_spill] sm:$0xff] %v3691_v61  ;;  %4855 = vst [vmem:[#allocation107_spill] sm:$0xff] %v3693_v54  ;;  %1645 = vperm.xlu1 %2897, %v4856_v37   ;;  %1649 = vperm.xlu0 %2896, %v4857_v38   ;;  %v3697_v47 = vpop.f32.mrb[15].mxu0  ;;  %v3699_v45 = vpop.f32.mrb[15].mxu1 }
 0x118   : > { %4858 = vst [vmem:[#allocation108_spill] sm:$0xff] %v3697_v47  ;;  %4859 = vst [vmem:[#allocation109_spill] sm:$0xff] %v3699_v45 }
 0x119   : > { %v3701_v46 = vpop.permute.xlu1 %1336  ;;  %v3703_v29 = vpop.permute.xlu0 %1331 }
 0x11a   : > { %4860 = vst [vmem:[#allocation110_spill] sm:$0xff] %v3701_v46  ;;  %4861 = vst [vmem:[#allocation111_spill] sm:$0xff] %v3703_v29  ;;  %v3018_v29 = vmov 1  }
 0x11b   : > { %1653 = vperm.xlu1 %2897, %v3447_v10   ;;  %1657 = vperm.xlu0 %2896, %v4862_v32   ;;  %v3707_v53 = vpop.f32.mrb[16].mxu0  ;;  %v3709_v61 = vpop.f32.mrb[16].mxu1 }
 0x11c   : > { %4863 = vst [vmem:[#allocation112_spill] sm:$0xff] %v3707_v53  ;;  %v3711_v54 = vpop.f32.mrb[17].mxu0  ;;  %v3713_v37 = vpop.f32.mrb[17].mxu1 }
 0x11d   : > { %4864 = vst [vmem:[#allocation113_spill] sm:$0xff] %v3711_v54  ;;  %v3715_v38 = vpop.f32.mrb[18].mxu0  ;;  %v3717_v47 = vpop.f32.mrb[18].mxu1 }
 0x11e   : > { %4865 = vst [vmem:[#allocation114_spill] sm:$0xff] %v3715_v38  ;;  %v3719_v45 = vpop.permute.xlu1 %1409  ;;  %v3721_v46 = vpop.permute.xlu0 %1405 }
 0x11f   : > { %4866 = vst [vmem:[#allocation115_spill] sm:$0xff] %v3719_v45  ;;  %4867 = vst [vmem:[#allocation116_spill] sm:$0xff] %v3721_v46  ;;  %2898 = vset.pattern.permute.xlu1 %v3018_v29  ;;  %2899 = vset.pattern.permute.xlu0 %v3018_v29  ;;  %v3723_v32 = vpop.f32.mrb[19].mxu0  ;;  %v3725_v53 = vpop.f32.mrb[19].mxu1 }
 0x120   : > { %4868 = vst [vmem:[#allocation117_spill] sm:$0xff] %v3723_v32  ;;  %1794 = vperm.xlu1 %2898, %v3132_v5   ;;  %1798 = vperm.xlu0 %2899, %v3140_v7  }
 0x122   : > { %v3729_v54 = vpop.permute.xlu1 %1413  ;;  %v3731_v38 = vpop.permute.xlu0 %1417 }
 0x123   : > { %4869 = vst [vmem:[#allocation118_spill] sm:$0xff] %v3729_v54  ;;  %4870 = vst [vmem:[#allocation119_spill] sm:$0xff] %v3731_v38  ;;  %v3733_v10 = vpop.f32.mrb[20].mxu0  ;;  %v3735_v45 = vpop.f32.mrb[20].mxu1 }
 0x124   : > { %4871 = vst [vmem:[#allocation120_spill] sm:$0xff] %v3733_v10  ;;  %1802 = vperm.xlu1 %2898, %v3129_v4   ;;  %1810 = vperm.xlu0 %2899, %v3153_v12   ;;  %v3739_v29 = vpop.f32.mrb[21].mxu0  ;;  %v3741_v32 = vpop.f32.mrb[21].mxu1 }
 0x125   : > { %4872 = vst [vmem:[#allocation121_spill] sm:$0xff] %v3739_v29  ;;  %v3743_v46 = vpop.f32.mrb[22].mxu0  ;;  %v3745_v5 = vpop.f32.mrb[22].mxu1 }
 0x126   : > { %4873 = vst [vmem:[#allocation122_spill] sm:$0xff] %v3743_v46  ;;  %v3747_v7 = vpop.permute.xlu1 %1421  ;;  %v3749_v54 = vpop.permute.xlu0 %1425 }
 0x127   : > { %4874 = vst [vmem:[#allocation123_spill] sm:$0xff] %v3747_v7  ;;  %4875 = vst [vmem:[#allocation124_spill] sm:$0xff] %v3749_v54  ;;  %v3751_v38 = vpop.f32.mrb[23].mxu0  ;;  %v3753_v10 = vpop.f32.mrb[23].mxu1 }
 0x128   : > { %4876 = vst [vmem:[#allocation125_spill] sm:$0xff] %v3751_v38  ;;  %1806 = vperm.xlu1 %2898, %v3137_v6   ;;  %1818 = vperm.xlu0 %2899, %v3167_v18  }
 0x12a   : > { %v3757_v4 = vpop.permute.xlu1 %1429  ;;  %v3759_v12 = vpop.permute.xlu0 %1433 }
 0x12b   : > { %4877 = vst [vmem:[#allocation126_spill] sm:$0xff] %v3757_v4  ;;  %4878 = vst [vmem:[#allocation127_spill] sm:$0xff] %v3759_v12  ;;  %v3761_v29 = vpop.f32.mrb[24].mxu0  ;;  %v3763_v46 = vpop.f32.mrb[24].mxu1 }
 0x12c   : > { %4879 = vst [vmem:[#allocation128_spill] sm:$0xff] %v3761_v29  ;;  %1814 = vperm.xlu1 %2898, %v3150_v11   ;;  %1826 = vperm.xlu0 %2899, %v3179_v20   ;;  %v3767_v54 = vpop.f32.mrb[25].mxu0  ;;  %v3769_v38 = vpop.f32.mrb[25].mxu1 }
 0x12d   : > { %4880 = vst [vmem:[#allocation129_spill] sm:$0xff] %v3767_v54  ;;  %v3771_v7 = vpop.f32.mrb[26].mxu0  ;;  %v3773_v6 = vpop.f32.mrb[26].mxu1 }
 0x12e   : > { %4881 = vst [vmem:[#allocation130_spill] sm:$0xff] %v3771_v7  ;;  %4882 = vst [vmem:[#allocation131_spill] sm:$0xff] %v3773_v6  ;;  %v3775_v18 = vpop.permute.xlu1 %1437  ;;  %v3777_v4 = vpop.permute.xlu0 %1441 }
 0x12f   : > { %4883 = vst [vmem:[#allocation132_spill] sm:$0xff] %v3775_v18  ;;  %4884 = vst [vmem:[#allocation133_spill] sm:$0xff] %v3777_v4  ;;  %v3779_v12 = vpop.f32.mrb[27].mxu0  ;;  %v3781_v29 = vpop.f32.mrb[27].mxu1 }
 0x130   : > { %4885 = vst [vmem:[#allocation134_spill] sm:$0xff] %v3779_v12  ;;  %1822 = vperm.xlu1 %2898, %v3163_v16   ;;  %1834 = vperm.xlu0 %2899, %v3191_v26  }
 0x132   : > { %v3785_v11 = vpop.permute.xlu1 %1445  ;;  %v3787_v20 = vpop.permute.xlu0 %1449 }
 0x133   : > { %4886 = vst [vmem:[#allocation135_spill] sm:$0xff] %v3785_v11  ;;  %4887 = vst [vmem:[#allocation136_spill] sm:$0xff] %v3787_v20  ;;  %v3789_v54 = vpop.f32.mrb[28].mxu0  ;;  %v3791_v7 = vpop.f32.mrb[28].mxu1 }
 0x134   : > { %4888 = vst [vmem:[#allocation137_spill] sm:$0xff] %v3789_v54  ;;  %1830 = vperm.xlu1 %2898, %v3172_v19   ;;  %1842 = vperm.xlu0 %2899, %v3203_v28   ;;  %v3795_v4 = vpop.f32.mrb[29].mxu0  ;;  %v3797_v12 = vpop.f32.mrb[29].mxu1 }
 0x135   : > { %4889 = vst [vmem:[#allocation138_spill] sm:$0xff] %v3795_v4  ;;  %v2793_v18 = vpop.f32.mrb[30].mxu0  ;;  %v3799_v16 = vpop.f32.mrb[30].mxu1 }
 0x136   : > { %v3801_v26 = vpop.permute.xlu1 %1453  ;;  %v3803_v11 = vpop.permute.xlu0 %1457 }
 0x137   : > { %4890 = vst [vmem:[#allocation139_spill] sm:$0xff] %v3803_v11  ;;  %v815_v20 = vpop.f32.mrb[31].mxu0  ;;  %v3805_v6 = vpop.f32.mrb[31].mxu1 }
 0x138   : > { %1838 = vperm.xlu1 %2898, %v3188_v25   ;;  %1850 = vperm.xlu0 %2899, %v3215_v34  }
 0x13a   : > { %v3809_v19 = vpop.permute.xlu1 %1461  ;;  %v3811_v28 = vpop.permute.xlu0 %1465 }
 0x13b   : > { %4891 = vst [vmem:[#allocation140_spill] sm:$0xff] %v3809_v19  ;;  %4892 = vst [vmem:[#allocation141_spill] sm:$0xff] %v3811_v28  ;;  %v4896_v28 = vld [vmem:[#allocation5_spill] sm:$0xff] }
 0x13c   : > { %1846 = vperm.xlu1 %2898, %v3196_v27   ;;  %1858 = vperm.xlu0 %2899, %v3227_v36  }
 0x13e   : > { %v3815_v54 = vpop.permute.xlu1 %1469  ;;  %v3817_v4 = vpop.permute.xlu0 %1473 }
 0x140   : > { %1854 = vperm.xlu1 %2898, %v3212_v33   ;;  %1866 = vperm.xlu0 %2899, %v3239_v42  }
 0x142   : > { %v3821_v11 = vpop.permute.xlu1 %1477  ;;  %v3823_v25 = vpop.permute.xlu0 %1481 }
 0x144   : > { %1862 = vperm.xlu1 %2898, %v3220_v35   ;;  %1874 = vperm.xlu0 %2899, %v3251_v44  }
 0x146   : > { %v3827_v34 = vpop.permute.xlu1 %1485  ;;  %v3829_v27 = vpop.permute.xlu0 %1489 }
 0x148   : > { %1870 = vperm.xlu1 %2898, %v3236_v41   ;;  %1882 = vperm.xlu0 %2899, %v3263_v50  }
 0x14a   : > { %v3833_v36 = vpop.permute.xlu1 %1493  ;;  %v3835_v33 = vpop.permute.xlu0 %1497 }
 0x14c   : > { %1878 = vperm.xlu1 %2898, %v3244_v43   ;;  %1890 = vperm.xlu0 %2899, %v3275_v52   ;;  %v3854_v43 = vld [vmem:[%s4711_s4] ss:$0 sm:$0xff] }
 0x14e   : > { %v3839_v42 = vpop.permute.xlu1 %1501  ;;  %v3841_v35 = vpop.permute.xlu0 %1505 }
 0x14f   : > { %4893 = vst [vmem:[#allocation142_spill] sm:$0xff] %v3841_v35  ;;  %v4897_v35 = vld [vmem:[#allocation6_spill] sm:$0xff] }
 0x150   : > { %1886 = vperm.xlu1 %2898, %v3260_v49   ;;  %1898 = vperm.xlu0 %2899, %v3287_v58   ;;  %v1368_v49 = vmul.f32 %v3535_v9, %v815_v20 }
 0x152   : > { %v3845_v44 = vpop.permute.xlu1 %1509  ;;  %v3847_v41 = vpop.permute.xlu0 %1513 }
 0x153   : > { %4894 = vst [vmem:[#allocation143_spill] sm:$0xff] %v3845_v44  ;;  %4895 = vst [vmem:[#allocation144_spill] sm:$0xff] %v3847_v41  ;;  %v1370_v44 = vmul.f32 %v2793_v18, %v3541_v62  ;;  %v4899_v18 = vld [vmem:[#allocation7_spill] sm:$0xff] }
 0x154   : > { %1894 = vperm.xlu1 %2898, %v3272_v51   ;;  %1906 = vperm.xlu0 %2899, %v3299_v60  }
 0x156   : > { %v3856_v50 = vpop.permute.xlu1 %1517  ;;  %v1522_v52 = vpop.permute.xlu0 %1521 }
 0x157   : > { %v1693_v58 = vmul.f32 %v3854_v43, %v1522_v52 }
 0x158   : > { %1902 = vperm.xlu1 %2898, %v4896_v28   ;;  %1914 = vperm.xlu0 %2899, %v3311_v2   ;;  %v1371_v2 = vmul.f32 %v3549_v0, %v3601_v15  ;;  %v4898_v28 = vld [vmem:[#allocation64_spill] sm:$0xff]  ;;  %v1373_v15 = vmul.f32 %v3597_v13, %v3555_v57  ;;  %v4900_v0 = vld [vmem:[#allocation65_spill] sm:$0xff]  ;;  %v1375_v57 = vmul.f32 %v3561_v59, %v3629_v40  ;;  %v4902_v13 = vld [vmem:[#allocation66_spill] sm:$0xff] }
 0x159   : > { %v3862_v41 = vadd.f32 %v1693_v58, %v1368_v49  ;;  %v1372_v49 = vmul.f32 %v4898_v28, %v3615_v23  ;;  %v1374_v23 = vmul.f32 %v3609_v21, %v4900_v0  ;;  %v1376_v21 = vmul.f32 %v4902_v13, %v3643_v1  ;;  %v4904_v40 = vld [vmem:[#allocation67_spill] sm:$0xff] }
 0x15a   : > { %v3864_v51 = vpop.permute.xlu1 %1525  ;;  %v1530_v60 = vpop.permute.xlu0 %1529  ;;  %v1377_v59 = vmul.f32 %v3625_v31, %v3567_v63  ;;  %v1378_v1 = vmul.f32 %v3637_v3, %v4904_v40  ;;  %v1379_v31 = vmul.f32 %v3573_v55, %v3657_v48  ;;  %v4906_v63 = vld [vmem:[#allocation68_spill] sm:$0xff]  ;;  %v4907_v13 = vld [vmem:[#allocation11_spill] sm:$0xff]  ;;  %v4911_v55 = vld [vmem:[#allocation69_spill] sm:$0xff] }
 0x15b   : > { %v1695_v19 = vmul.f32 %v3854_v43, %v1530_v60  ;;  %v1380_v3 = vmul.f32 %v4906_v63, %v3671_v39  ;;  %v4918_v63 = vld [vmem:[#allocation109_spill] sm:$0xff] }
 0x15c   : > { %1910 = vperm.xlu1 %2898, %v4897_v35   ;;  %1922 = vperm.xlu0 %2899, %v3323_v8  }
 0x15d   : > { %v3870_v9 = vadd.f32 %v1695_v19, %v1370_v44 }
 0x15e   : > { %v1534_v20 = vpop.permute.xlu1 %1533  ;;  %v1538_v52 = vpop.permute.xlu0 %1537 }
 0x15f   : > { %v1696_v58 = vmul.f32 %v3854_v43, %v1534_v20  ;;  %v1697_v62 = vmul.f32 %v3854_v43, %v1538_v52  ;;  %v4901_v52 = vld [vmem:[#allocation8_spill] sm:$0xff] }
 0x160   : > { %1918 = vperm.xlu1 %2898, %v4899_v18   ;;  %1930 = vperm.xlu0 %2899, %v3333_v14   ;;  %v4903_v18 = vld [vmem:[#allocation9_spill] sm:$0xff] }
 0x161   : > { %v3880_v35 = vadd.f32 %v1696_v58, %v1371_v2  ;;  %v3882_v8 = vadd.f32 %v1697_v62, %v1372_v49 }
 0x162   : > { %v1542_v19 = vpop.permute.xlu1 %1541  ;;  %v1546_v44 = vpop.permute.xlu0 %1545 }
 0x163   : > { %v1698_v60 = vmul.f32 %v3854_v43, %v1542_v19  ;;  %v1699_v20 = vmul.f32 %v3854_v43, %v1546_v44 }
 0x164   : > { %1926 = vperm.xlu1 %2898, %v4901_v52   ;;  %1938 = vperm.xlu0 %2899, %v3343_v17  }
 0x165   : > { %v3892_v14 = vadd.f32 %v1698_v60, %v1373_v15  ;;  %v3894_v2 = vadd.f32 %v1699_v20, %v1374_v23  ;;  %v4905_v60 = vld [vmem:[#allocation10_spill] sm:$0xff] }
 0x166   : > { %v1550_v28 = vpop.permute.xlu1 %1549  ;;  %v1554_v49 = vpop.permute.xlu0 %1553 }
 0x167   : > { %v1700_v58 = vmul.f32 %v3854_v43, %v1550_v28  ;;  %v1701_v62 = vmul.f32 %v3854_v43, %v1554_v49 }
 0x168   : > { %1934 = vperm.xlu1 %2898, %v4903_v18   ;;  %1946 = vperm.xlu0 %2899, %v3351_v22   ;;  %v4909_v18 = vld [vmem:[#allocation70_spill] sm:$0xff] }
 0x169   : > { %v3904_v17 = vadd.f32 %v1700_v58, %v1375_v57  ;;  %v3906_v19 = vadd.f32 %v1701_v62, %v1376_v21 }
 0x16a   : > { %v1558_v44 = vpop.permute.xlu1 %1557  ;;  %v1562_v15 = vpop.permute.xlu0 %1561 }
 0x16b   : > { %v1702_v0 = vmul.f32 %v3854_v43, %v1558_v44  ;;  %v1703_v23 = vmul.f32 %v3854_v43, %v1562_v15  ;;  %v4910_v44 = vld [vmem:[#allocation92_spill] sm:$0xff]  ;;  %v4912_v15 = vld [vmem:[#allocation97_spill] sm:$0xff] }
 0x16c   : > { %1942 = vperm.xlu1 %2898, %v4905_v60   ;;  %1954 = vperm.xlu0 %2899, %v3359_v24   ;;  %v1381_v48 = vmul.f32 %v4910_v44, %v4909_v18  ;;  %v1382_v39 = vmul.f32 %v4912_v15, %v4911_v55  ;;  %v4924_v15 = vld [vmem:[#allocation74_spill] sm:$0xff] }
 0x16d   : > { %v3916_v22 = vadd.f32 %v1702_v0, %v1377_v59  ;;  %v3918_v20 = vadd.f32 %v1703_v23, %v1378_v1  ;;  %v4913_v1 = vld [vmem:[#allocation12_spill] sm:$0xff]  ;;  %v4914_v0 = vld [vmem:[#allocation15_spill] sm:$0xff] }
 0x16e   : > { %v1566_v52 = vpop.permute.xlu1 %1565  ;;  %v1570_v28 = vpop.permute.xlu0 %1569 }
 0x16f   : > { %v1704_v49 = vmul.f32 %v3854_v43, %v1566_v52  ;;  %v1705_v57 = vmul.f32 %v3854_v43, %v1570_v28  ;;  %v4917_v28 = vld [vmem:[#allocation72_spill] sm:$0xff] }
 0x170   : > { %1950 = vperm.xlu1 %2898, %v4907_v13   ;;  %1962 = vperm.xlu0 %2899, %v3367_v30  }
 0x171   : > { %v3928_v24 = vadd.f32 %v1704_v49, %v1379_v31  ;;  %v3930_v21 = vadd.f32 %v1705_v57, %v1380_v3  ;;  %v1383_v31 = vmul.f32 %v4917_v28, %v3685_v56  ;;  %v4919_v3 = vld [vmem:[#allocation71_spill] sm:$0xff] }
 0x172   : > { %v1574_v58 = vpop.permute.xlu1 %1573  ;;  %v1578_v62 = vpop.permute.xlu0 %1577  ;;  %v1384_v49 = vmul.f32 %v4919_v3, %v4918_v63  ;;  %v4929_v28 = vld [vmem:[#allocation19_spill] sm:$0xff] }
 0x173   : > { %4908 = vst [vmem:[#allocation5_spill] sm:$0xff] %v3930_v21  ;;  %v1706_v59 = vmul.f32 %v3854_v43, %v1574_v58  ;;  %v1707_v40 = vmul.f32 %v3854_v43, %v1578_v62  ;;  %v4920_v58 = vld [vmem:[#allocation13_spill] sm:$0xff] }
 0x174   : > { %1958 = vperm.xlu1 %2898, %v4913_v1   ;;  %1970 = vperm.xlu0 %2899, %v4914_v0   ;;  %v4921_v62 = vld [vmem:[#allocation17_spill] sm:$0xff] }
 0x175   : > { %v3940_v30 = vadd.f32 %v1706_v59, %v1381_v48  ;;  %v3942_v23 = vadd.f32 %v1707_v40, %v1382_v39  ;;  %v4925_v39 = vld [vmem:[#allocation102_spill] sm:$0xff]  ;;  %v4926_v59 = vld [vmem:[#allocation73_spill] sm:$0xff]  ;;  %v4927_v40 = vld [vmem:[#allocation107_spill] sm:$0xff] }
 0x176   : > { %v1582_v60 = vpop.permute.xlu1 %1581  ;;  %v1586_v52 = vpop.permute.xlu0 %1585  ;;  %v1385_v56 = vmul.f32 %v4925_v39, %v4924_v15  ;;  %v1386_v1 = vmul.f32 %v4927_v40, %v4926_v59  ;;  %v4934_v15 = vld [vmem:[#allocation16_spill] sm:$0xff]  ;;  %v4935_v39 = vld [vmem:[#allocation21_spill] sm:$0xff] }
 0x177   : > { %4915 = vst [vmem:[#allocation6_spill] sm:$0xff] %v3940_v30  ;;  %4916 = vst [vmem:[#allocation64_spill] sm:$0xff] %v3942_v23  ;;  %v1708_v57 = vmul.f32 %v3854_v43, %v1582_v60  ;;  %v1709_v13 = vmul.f32 %v3854_v43, %v1586_v52  ;;  %v4928_v52 = vld [vmem:[#allocation14_spill] sm:$0xff]  ;;  %v4991_v23 = vld [vmem:[#allocation39_spill] sm:$0xff] }
 0x178   : > { %1966 = vperm.xlu1 %2898, %v4920_v58   ;;  %1978 = vperm.xlu0 %2899, %v4921_v62   ;;  %v4933_v58 = vld [vmem:[#allocation77_spill] sm:$0xff] }
 0x179   : > { %v3952_v18 = vadd.f32 %v1708_v57, %v1383_v31  ;;  %v3954_v44 = vadd.f32 %v1709_v13, %v1384_v49  ;;  %v4932_v57 = vld [vmem:[#allocation78_spill] sm:$0xff]  ;;  %v1388_v62 = vmul.f32 %v4933_v58, %v3725_v53 }
 0x17a   : > { %v1590_v48 = vpop.permute.xlu1 %1589  ;;  %v1594_v55 = vpop.permute.xlu0 %1593  ;;  %v1387_v13 = vmul.f32 %v4932_v57, %v3713_v37 }
 0x17b   : > { %4922 = vst [vmem:[#allocation7_spill] sm:$0xff] %v3952_v18  ;;  %4923 = vst [vmem:[#allocation65_spill] sm:$0xff] %v3954_v44  ;;  %v1710_v0 = vmul.f32 %v3854_v43, %v1590_v48  ;;  %v1711_v60 = vmul.f32 %v3854_v43, %v1594_v55  ;;  %v4987_v18 = vld [vmem:[#allocation36_spill] sm:$0xff] }
 0x17c   : > { %1974 = vperm.xlu1 %2898, %v4928_v52   ;;  %1986 = vperm.xlu0 %2899, %v4929_v28  }
 0x17d   : > { %v3964_v31 = vadd.f32 %v1710_v0, %v1385_v56  ;;  %v3966_v63 = vadd.f32 %v1711_v60, %v1386_v1  ;;  %v4936_v0 = vld [vmem:[#allocation82_spill] sm:$0xff]  ;;  %v4937_v60 = vld [vmem:[#allocation81_spill] sm:$0xff] }
 0x17e   : > { %v1598_v3 = vpop.permute.xlu1 %1597  ;;  %v1602_v49 = vpop.permute.xlu0 %1601  ;;  %v1389_v37 = vmul.f32 %v3709_v61, %v4936_v0  ;;  %v1390_v53 = vmul.f32 %v3717_v47, %v4937_v60 }
 0x17f   : > { %4930 = vst [vmem:[#allocation8_spill] sm:$0xff] %v3964_v31  ;;  %4931 = vst [vmem:[#allocation66_spill] sm:$0xff] %v3966_v63  ;;  %v1712_v48 = vmul.f32 %v3854_v43, %v1598_v3  ;;  %v1713_v55 = vmul.f32 %v3854_v43, %v1602_v49  ;;  %v4938_v3 = vld [vmem:[#allocation18_spill] sm:$0xff]  ;;  %v4939_v49 = vld [vmem:[#allocation23_spill] sm:$0xff] }
 0x180   : > { %1982 = vperm.xlu1 %2898, %v4934_v15   ;;  %1994 = vperm.xlu0 %2899, %v4935_v39  }
 0x181   : > { %v3976_v56 = vadd.f32 %v1712_v48, %v1387_v13  ;;  %v3978_v59 = vadd.f32 %v1713_v55, %v1388_v62  ;;  %v4940_v48 = vld [vmem:[#allocation86_spill] sm:$0xff]  ;;  %v4941_v55 = vld [vmem:[#allocation85_spill] sm:$0xff] }
 0x182   : > { %v1606_v40 = vpop.permute.xlu1 %1605  ;;  %v1610_v1 = vpop.permute.xlu0 %1609  ;;  %v1391_v61 = vmul.f32 %v4940_v48, %v3741_v32  ;;  %v1392_v47 = vmul.f32 %v4941_v55, %v3753_v10 }
 0x183   : > { %v1714_v52 = vmul.f32 %v3854_v43, %v1606_v40  ;;  %v1715_v28 = vmul.f32 %v3854_v43, %v1610_v1  ;;  %v4942_v40 = vld [vmem:[#allocation20_spill] sm:$0xff]  ;;  %v4943_v1 = vld [vmem:[#allocation25_spill] sm:$0xff] }
 0x184   : > { %1990 = vperm.xlu1 %2898, %v4938_v3   ;;  %2002 = vperm.xlu0 %2899, %v4939_v49  }
 0x185   : > { %v3988_v57 = vadd.f32 %v1714_v52, %v1389_v37  ;;  %v3990_v13 = vadd.f32 %v1715_v28, %v1390_v53  ;;  %v4946_v52 = vld [vmem:[#allocation90_spill] sm:$0xff]  ;;  %v4947_v28 = vld [vmem:[#allocation89_spill] sm:$0xff] }
 0x186   : > { %v1614_v58 = vpop.permute.xlu1 %1613  ;;  %v1618_v62 = vpop.permute.xlu0 %1617  ;;  %v1393_v32 = vmul.f32 %v3735_v45, %v4946_v52  ;;  %v1394_v10 = vmul.f32 %v3745_v5, %v4947_v28 }
 0x187   : > { %v1716_v15 = vmul.f32 %v3854_v43, %v1614_v58  ;;  %v1717_v39 = vmul.f32 %v3854_v43, %v1618_v62  ;;  %v4948_v58 = vld [vmem:[#allocation22_spill] sm:$0xff]  ;;  %v4949_v62 = vld [vmem:[#allocation27_spill] sm:$0xff] }
 0x188   : > { %1998 = vperm.xlu1 %2898, %v4942_v40   ;;  %2010 = vperm.xlu0 %2899, %v4943_v1  }
 0x189   : > { %v4000_v0 = vadd.f32 %v1716_v15, %v1391_v61  ;;  %v4002_v37 = vadd.f32 %v1717_v39, %v1392_v47  ;;  %v4952_v15 = vld [vmem:[#allocation95_spill] sm:$0xff]  ;;  %v4953_v39 = vld [vmem:[#allocation94_spill] sm:$0xff] }
 0x18a   : > { %v1622_v60 = vpop.permute.xlu1 %1621  ;;  %v1626_v53 = vpop.permute.xlu0 %1625  ;;  %v1395_v45 = vmul.f32 %v4952_v15, %v3769_v38  ;;  %v1396_v5 = vmul.f32 %v4953_v39, %v3781_v29  ;;  %v4962_v15 = vld [vmem:[#allocation31_spill] sm:$0xff] }
 0x18b   : > { %4944 = vst [vmem:[#allocation9_spill] sm:$0xff] %v4000_v0  ;;  %4945 = vst [vmem:[#allocation67_spill] sm:$0xff] %v4002_v37  ;;  %v1718_v3 = vmul.f32 %v3854_v43, %v1622_v60  ;;  %v1719_v49 = vmul.f32 %v3854_v43, %v1626_v53  ;;  %v4954_v60 = vld [vmem:[#allocation24_spill] sm:$0xff]  ;;  %v4955_v53 = vld [vmem:[#allocation29_spill] sm:$0xff] }
 0x18c   : > { %2006 = vperm.xlu1 %2898, %v4948_v58   ;;  %2018 = vperm.xlu0 %2899, %v4949_v62   ;;  %v4960_v58 = vld [vmem:[#allocation131_spill] sm:$0xff] }
 0x18d   : > { %v4012_v48 = vadd.f32 %v1718_v3, %v1393_v32  ;;  %v4014_v61 = vadd.f32 %v1719_v49, %v1394_v10  ;;  %v4958_v3 = vld [vmem:[#allocation100_spill] sm:$0xff]  ;;  %v4959_v49 = vld [vmem:[#allocation99_spill] sm:$0xff] }
 0x18e   : > { %v1630_v55 = vpop.permute.xlu1 %1629  ;;  %v1634_v47 = vpop.permute.xlu0 %1633  ;;  %v1397_v38 = vmul.f32 %v3763_v46, %v4958_v3  ;;  %v1398_v29 = vmul.f32 %v4960_v58, %v4959_v49  ;;  %v4967_v3 = vld [vmem:[#allocation28_spill] sm:$0xff]  ;;  %v4968_v49 = vld [vmem:[#allocation33_spill] sm:$0xff]  ;;  %v4999_v37 = vld [vmem:[#allocation83_spill] sm:$0xff] }
 0x18f   : > { %4950 = vst [vmem:[#allocation10_spill] sm:$0xff] %v4012_v48  ;;  %4951 = vst [vmem:[#allocation68_spill] sm:$0xff] %v4014_v61  ;;  %v1720_v40 = vmul.f32 %v3854_v43, %v1630_v55  ;;  %v1721_v1 = vmul.f32 %v3854_v43, %v1634_v47  ;;  %v4961_v47 = vld [vmem:[#allocation26_spill] sm:$0xff]  ;;  %v4988_v61 = vld [vmem:[#allocation79_spill] sm:$0xff] }
 0x190   : > { %2014 = vperm.xlu1 %2898, %v4954_v60   ;;  %2026 = vperm.xlu0 %2899, %v4955_v53   ;;  %v4966_v60 = vld [vmem:[#allocation104_spill] sm:$0xff] }
 0x191   : > { %v4024_v52 = vadd.f32 %v1720_v40, %v1395_v45  ;;  %v4026_v32 = vadd.f32 %v1721_v1, %v1396_v5  ;;  %v4965_v1 = vld [vmem:[#allocation105_spill] sm:$0xff]  ;;  %v1400_v53 = vmul.f32 %v4966_v60, %v3805_v6 }
 0x192   : > { %v1638_v28 = vpop.permute.xlu1 %1637  ;;  %v1642_v10 = vpop.permute.xlu0 %1641  ;;  %v1399_v46 = vmul.f32 %v4965_v1, %v3797_v12 }
 0x193   : > { %4956 = vst [vmem:[#allocation11_spill] sm:$0xff] %v4024_v52  ;;  %4957 = vst [vmem:[#allocation70_spill] sm:$0xff] %v4026_v32  ;;  %v1722_v62 = vmul.f32 %v3854_v43, %v1638_v28  ;;  %v1723_v55 = vmul.f32 %v3854_v43, %v1642_v10  ;;  %v4985_v32 = vld [vmem:[#allocation75_spill] sm:$0xff] }
 0x194   : > { %2022 = vperm.xlu1 %2898, %v4961_v47   ;;  %2034 = vperm.xlu0 %2899, %v4962_v15   ;;  %v4972_v47 = vld [vmem:[#allocation110_spill] sm:$0xff] }
 0x195   : > { %v4036_v45 = vadd.f32 %v1722_v62, %v1397_v38  ;;  %v4038_v39 = vadd.f32 %v1723_v55, %v1398_v29  ;;  %v4971_v55 = vld [vmem:[#allocation111_spill] sm:$0xff]  ;;  %v1402_v6 = vmul.f32 %v3799_v16, %v4972_v47  ;;  %v4069_v16 = vld [vmem:[%s4711_s4 + $0x1] ss:$0 sm:$0xff]  ;;  %v4978_v47 = vld [vmem:[#allocation76_spill] sm:$0xff] }
 0x196   : > { %v1646_v5 = vpop.permute.xlu1 %1645  ;;  %v1650_v40 = vpop.permute.xlu0 %1649  ;;  %v1401_v12 = vmul.f32 %v3791_v7, %v4971_v55 }
 0x197   : > { %4963 = vst [vmem:[#allocation92_spill] sm:$0xff] %v4036_v45  ;;  %4964 = vst [vmem:[#allocation69_spill] sm:$0xff] %v4038_v39  ;;  %v1724_v28 = vmul.f32 %v3854_v43, %v1646_v5  ;;  %v1725_v10 = vmul.f32 %v3854_v43, %v1650_v40  ;;  %v4973_v40 = vld [vmem:[#allocation30_spill] sm:$0xff]  ;;  %v4982_v39 = vld [vmem:[#allocation37_spill] sm:$0xff] }
 0x198   : > { %2030 = vperm.xlu1 %2898, %v4967_v3   ;;  %2042 = vperm.xlu0 %2899, %v4968_v49  }
 0x199   : > { %v4048_v38 = vadd.f32 %v1724_v28, %v1399_v46  ;;  %v4050_v58 = vadd.f32 %v1725_v10, %v1400_v53  ;;  %v4976_v28 = vld [vmem:[#allocation32_spill] sm:$0xff] }
 0x19a   : > { %v1654_v29 = vpop.permute.xlu1 %1653  ;;  %v1658_v62 = vpop.permute.xlu0 %1657 }
 0x19b   : > { %4969 = vst [vmem:[#allocation97_spill] sm:$0xff] %v4048_v38  ;;  %4970 = vst [vmem:[#allocation12_spill] sm:$0xff] %v4050_v58  ;;  %v1726_v15 = vmul.f32 %v3854_v43, %v1654_v29  ;;  %v1727_v5 = vmul.f32 %v3854_v43, %v1658_v62  ;;  %v4977_v29 = vld [vmem:[#allocation116_spill] sm:$0xff] }
 0x19c   : > { %2038 = vperm.xlu1 %2898, %v4973_v40   ;;  %v1664_v62 = vmul.f32 %v3854_v43, %v4977_v29  ;;  %v4980_v40 = vld [vmem:[#allocation115_spill] sm:$0xff]  ;;  %v4981_v38 = vld [vmem:[#allocation80_spill] sm:$0xff] }
 0x19d   : > { %v4059_v1 = vadd.f32 %v1726_v15, %v1401_v12  ;;  %v4061_v46 = vadd.f32 %v1727_v5, %v1402_v6  ;;  %v4979_v6 = vld [vmem:[#allocation35_spill] sm:$0xff]  ;;  %v1340_v63 = vmul.f32 %v4982_v39, %v4981_v38 }
 0x19e   : > { %v1339_v15 = vmul.f32 %v4979_v6, %v4978_v47  ;;  %v2181_v47 = vld [vmem:[%s4709_s2] sm:$0xff] }
 0x19f   : > { %4974 = vst [vmem:[#allocation15_spill] sm:$0xff] %v4059_v1  ;;  %4975 = vst [vmem:[#allocation72_spill] sm:$0xff] %v4061_v46  ;;  %v1795_v60 = vpop.permute.xlu1 %1794  ;;  %v1799_v53 = vpop.permute.xlu0 %1798 }
 0x1a0   : > { %2046 = vperm.xlu1 %2898, %v4976_v28   ;;  %v2053_v5 = vmul.f32 %v4069_v16, %v1795_v60  ;;  %v1665_v28 = vmul.f32 %v3854_v43, %v4980_v40  ;;  %v1728_v46 = vadd.f32 %v1664_v62, %v1339_v15  ;;  %v2054_v45 = vmul.f32 %v4069_v16, %v1799_v53  ;;  %v4983_v60 = vld [vmem:[#allocation118_spill] sm:$0xff] }
 0x1a1   : > { %v1666_v31 = vmul.f32 %v3854_v43, %v4983_v60  ;;  %v4984_v15 = vld [vmem:[#allocation34_spill] sm:$0xff] }
 0x1a2   : > { %v2117_v29 = vadd.f32 %v2053_v5, %v1728_v46  ;;  %v1729_v6 = vadd.f32 %v1665_v28, %v1340_v63  ;;  %v1341_v44 = vmul.f32 %v4985_v32, %v4984_v15  ;;  %v2182_v46 = vld [vmem:[%s4709_s2 + $0x8] sm:$0xff]  ;;  %v4986_v63 = vld [vmem:[#allocation119_spill] sm:$0xff]  ;;  %v1342_v32 = vmul.f32 %v4988_v61, %v4987_v18 }
 0x1a3   : > { %v1803_v10 = vpop.permute.xlu1 %1802  ;;  %v1811_v3 = vpop.permute.xlu0 %1810  ;;  %v1667_v5 = vmul.f32 %v3854_v43, %v4986_v63  ;;  %v4990_v63 = vld [vmem:[#allocation84_spill] sm:$0xff] }
 0x1a4   : > { %v2245_v52 = vadd.f32 %v2181_v47, %v2117_v29  ;;  %v2118_v39 = vadd.f32 %v2054_v45, %v1729_v6  ;;  %v2055_v38 = vmul.f32 %v4069_v16, %v1803_v10  ;;  %v1730_v53 = vadd.f32 %v1666_v31, %v1341_v44  ;;  %v2183_v47 = vld [vmem:[%s4709_s2 + $0x10] sm:$0xff] }
 0x1a5   : > { %v1731_v44 = vadd.f32 %v1667_v5, %v1342_v32  ;;  %v4989_v31 = vld [vmem:[#allocation123_spill] sm:$0xff]  ;;  %v1343_v48 = vmul.f32 %v4991_v23, %v4990_v63  ;;  %v2057_v61 = vmul.f32 %v4069_v16, %v1811_v3  ;;  %v4993_v32 = vld [vmem:[#allocation113_spill] sm:$0xff] }
 0x1a6   : > { %v2246_v29 = vadd.f32 %v2182_v46, %v2118_v39  ;;  %v2119_v45 = vadd.f32 %v2055_v38, %v1730_v53  ;;  %v1668_v6 = vmul.f32 %v3854_v43, %v4989_v31  ;;  %v2184_v38 = vld [vmem:[%s4709_s2 + $0x18] sm:$0xff] }
 0x1a7   : > { %v1807_v7 = vpop.permute.xlu1 %1806  ;;  %v4064_v49 = vpop.permute.xlu0 %1818  ;;  %v4992_v53 = vld [vmem:[#allocation124_spill] sm:$0xff] }
 0x1a8   : > { %v2056_v10 = vmul.f32 %v4069_v16, %v1807_v7  ;;  %v2247_v18 = vadd.f32 %v2183_v47, %v2119_v45  ;;  %v1680_v7 = vmul.f32 %v3854_v43, %v3815_v54  ;;  %v1732_v46 = vadd.f32 %v1668_v6, %v1343_v48  ;;  %v4996_v47 = vld [vmem:[#allocation38_spill] sm:$0xff] }
 0x1a9   : > { %v1669_v5 = vmul.f32 %v3854_v43, %v4992_v53  ;;  %v1681_v6 = vmul.f32 %v3854_v43, %v3817_v4  ;;  %v2059_v4 = vmul.f32 %v4069_v16, %v4064_v49  ;;  %v5004_v49 = vld [vmem:[#allocation112_spill] sm:$0xff] }
 0x1aa   : > { %v2120_v39 = vadd.f32 %v2056_v10, %v1731_v44  ;;  %v4995_v10 = vld [vmem:[#allocation88_spill] sm:$0xff]  ;;  %v2121_v44 = vadd.f32 %v2057_v61, %v1732_v46  ;;  %v5000_v61 = vld [vmem:[#allocation117_spill] sm:$0xff] }
 0x1ab   : > { %v1815_v55 = vpop.permute.xlu1 %1814  ;;  %v4073_v12 = vpop.permute.xlu0 %1826  ;;  %v1344_v54 = vmul.f32 %v4996_v47, %v4995_v10 }
 0x1ac   : > { %v2248_v63 = vadd.f32 %v2184_v38, %v2120_v39  ;;  %v2058_v30 = vmul.f32 %v4069_v16, %v1815_v55  ;;  %v5001_v39 = vld [vmem:[#allocation50_spill] sm:$0xff] }
 0x1ad   : > { %v1733_v53 = vadd.f32 %v1669_v5, %v1344_v54  ;;  %v1356_v38 = vmul.f32 %v5001_v39, %v5000_v61  ;;  %v2197_v5 = vld [vmem:[%s4709_s2 + $0x80] sm:$0xff] }
 0x1af   : > { %v4080_v1 = vpop.permute.xlu1 %1822  ;;  %v4082_v58 = vpop.permute.xlu0 %1834  ;;  %v2122_v47 = vadd.f32 %v2058_v30, %v1733_v53  ;;  %v5003_v30 = vld [vmem:[#allocation53_spill] sm:$0xff] }
 0x1b0   : > { %v1357_v53 = vmul.f32 %v5004_v49, %v5003_v30  ;;  %v5011_v49 = vld [vmem:[#allocation43_spill] sm:$0xff] }
 0x1b3   : > { %v4092_v40 = vpop.permute.xlu1 %1830  ;;  %v4094_v62 = vpop.permute.xlu0 %1842 }
 0x1b6   : > { %2309 = vxpose.xlu0.b32.start [1/16] %v2245_v52, 128 }
 0x1b7   : > { %v4104_v28 = vpop.permute.xlu1 %1838  ;;  %v4106_v60 = vpop.permute.xlu0 %1850 }
 0x1ba   : > { %2310 = vxpose.xlu0.b32.cont [2/16] %v2246_v29, 128  ;;  %v4994_v29 = vld [vmem:[#allocation51_spill] sm:$0xff] }
 0x1bb   : > { %v4116_v52 = vpop.permute.xlu1 %1846  ;;  %v1859_v15 = vpop.permute.xlu0 %1858  ;;  %v1355_v31 = vmul.f32 %v4994_v29, %v4993_v32  ;;  %v4998_v29 = vld [vmem:[#allocation41_spill] sm:$0xff] }
 0x1bc   : > { %v2069_v23 = vmul.f32 %v4069_v16, %v1859_v15  ;;  %v4997_v15 = vld [vmem:[#allocation126_spill] sm:$0xff]  ;;  %v1345_v10 = vmul.f32 %v4999_v37, %v4998_v29  ;;  %v1682_v37 = vmul.f32 %v3854_v43, %v3821_v11  ;;  %v5005_v11 = vld [vmem:[#allocation40_spill] sm:$0xff] }
 0x1bd   : > { %v1744_v48 = vadd.f32 %v1680_v7, %v1355_v31  ;;  %v1670_v32 = vmul.f32 %v3854_v43, %v4997_v15 }
 0x1be   : > { %2311 = vxpose.xlu0.b32.cont [3/16] %v2247_v18, 128  ;;  %v2185_v18 = vld [vmem:[%s4709_s2 + $0x20] sm:$0xff] }
 0x1bf   : > { %v4131_v45 = vpop.permute.xlu1 %1854  ;;  %v1867_v3 = vpop.permute.xlu0 %1866  ;;  %v2133_v55 = vadd.f32 %v2069_v23, %v1744_v48  ;;  %v2249_v31 = vadd.f32 %v2185_v18, %v2121_v44  ;;  %v2186_v23 = vld [vmem:[%s4709_s2 + $0x28] sm:$0xff]  ;;  %v1734_v48 = vadd.f32 %v1670_v32, %v1345_v10  ;;  %v5002_v44 = vld [vmem:[#allocation127_spill] sm:$0xff]  ;;  %v2060_v32 = vmul.f32 %v4069_v16, %v4080_v1 }
 0x1c0   : > { %v1671_v18 = vmul.f32 %v3854_v43, %v5002_v44  ;;  %v2071_v29 = vmul.f32 %v4069_v16, %v1867_v3  ;;  %v2250_v0 = vadd.f32 %v2186_v23, %v2122_v47  ;;  %v2198_v10 = vld [vmem:[%s4709_s2 + $0x88] sm:$0xff]  ;;  %v1683_v3 = vmul.f32 %v3854_v43, %v3823_v25  ;;  %v5008_v47 = vld [vmem:[#allocation52_spill] sm:$0xff]  ;;  %v5010_v25 = vld [vmem:[#allocation93_spill] sm:$0xff] }
 0x1c1   : > { %v2261_v15 = vadd.f32 %v2197_v5, %v2133_v55  ;;  %v2123_v21 = vadd.f32 %v2059_v4, %v1734_v48  ;;  %v2187_v55 = vld [vmem:[%s4709_s2 + $0x30] sm:$0xff]  ;;  %v5009_v1 = vld [vmem:[#allocation114_spill] sm:$0xff] }
 0x1c2   : > { %2312 = vxpose.xlu0.b32.cont [4/16] %v2248_v63, 128  ;;  %v1745_v63 = vadd.f32 %v1681_v6, %v1356_v38  ;;  %v5006_v38 = vld [vmem:[#allocation87_spill] sm:$0xff] }
 0x1c3   : > { %v1863_v7 = vpop.permute.xlu1 %1862  ;;  %v1875_v46 = vpop.permute.xlu0 %1874 }
 0x1c4   : > { %v2070_v54 = vmul.f32 %v4069_v16, %v1863_v7  ;;  %v1346_v7 = vmul.f32 %v5006_v38, %v5005_v11  ;;  %v2251_v11 = vadd.f32 %v2187_v55, %v2123_v21  ;;  %v2073_v55 = vmul.f32 %v4069_v16, %v1875_v46 }
 0x1c5   : > { %v1685_v46 = vmul.f32 %v3854_v43, %v3829_v27 }
 0x1c6   : > { %2313 = vxpose.xlu0.b32.cont [5/16] %v2249_v31, 128  ;;  %v2134_v61 = vadd.f32 %v2070_v54, %v1745_v63  ;;  %v1746_v31 = vadd.f32 %v1682_v37, %v1357_v53  ;;  %v1735_v5 = vadd.f32 %v1671_v18, %v1346_v7  ;;  %v5007_v54 = vld [vmem:[#allocation132_spill] sm:$0xff]  ;;  %v1358_v63 = vmul.f32 %v5009_v1, %v5008_v47  ;;  %v5012_v7 = vld [vmem:[#allocation133_spill] sm:$0xff]  ;;  %v5016_v47 = vld [vmem:[#allocation42_spill] sm:$0xff] }
 0x1c7   : > { %v1871_v6 = vpop.permute.xlu1 %1870  ;;  %v4163_v39 = vpop.permute.xlu0 %1882  ;;  %v1672_v4 = vmul.f32 %v3854_v43, %v5007_v54  ;;  %v1347_v53 = vmul.f32 %v5011_v49, %v5010_v25  ;;  %v2061_v18 = vmul.f32 %v4069_v16, %v4073_v12  ;;  %v1673_v21 = vmul.f32 %v3854_v43, %v5012_v7  ;;  %v5013_v12 = vld [vmem:[#allocation121_spill] sm:$0xff]  ;;  %v2200_v25 = vld [vmem:[%s4709_s2 + $0x98] sm:$0xff]  ;;  %v5021_v7 = vld [vmem:[#allocation91_spill] sm:$0xff] }
 0x1c8   : > { %v2135_v23 = vadd.f32 %v2071_v29, %v1746_v31  ;;  %v2262_v48 = vadd.f32 %v2198_v10, %v2134_v61  ;;  %v2072_v37 = vmul.f32 %v4069_v16, %v1871_v6  ;;  %v1747_v38 = vadd.f32 %v1683_v3, %v1358_v63  ;;  %v2188_v61 = vld [vmem:[%s4709_s2 + $0x38] sm:$0xff] }
 0x1c9   : > { %2341 = vxpose.xlu1.b32.start [1/16] %v2261_v15, 128  ;;  %v2124_v15 = vadd.f32 %v2060_v32, %v1735_v5  ;;  %v1684_v29 = vmul.f32 %v3854_v43, %v3827_v34  ;;  %v1736_v6 = vadd.f32 %v1672_v4, %v1347_v53  ;;  %v5014_v32 = vld [vmem:[#allocation55_spill] sm:$0xff]  ;;  %v5015_v34 = vld [vmem:[#allocation98_spill] sm:$0xff]  ;;  %v2062_v4 = vmul.f32 %v4069_v16, %v4092_v40 }
 0x1ca   : > { %2314 = vxpose.xlu0.b32.cont [6/16] %v2250_v0, 128  ;;  %v2199_v0 = vld [vmem:[%s4709_s2 + $0x90] sm:$0xff]  ;;  %v1359_v10 = vmul.f32 %v5014_v32, %v5013_v12  ;;  %v2136_v3 = vadd.f32 %v2072_v37, %v1747_v38  ;;  %v1348_v1 = vmul.f32 %v5016_v47, %v5015_v34  ;;  %v5019_v40 = vld [vmem:[#allocation54_spill] sm:$0xff]  ;;  %v5022_v47 = vld [vmem:[#allocation136_spill] sm:$0xff] }
 0x1cb   : > { %v1879_v44 = vpop.permute.xlu1 %1878  ;;  %v4182_v30 = vpop.permute.xlu0 %1890  ;;  %v2263_v31 = vadd.f32 %v2199_v0, %v2135_v23  ;;  %v2125_v63 = vadd.f32 %v2061_v18, %v1736_v6  ;;  %v2189_v23 = vld [vmem:[%s4709_s2 + $0x40] sm:$0xff]  ;;  %v5017_v53 = vld [vmem:[#allocation135_spill] sm:$0xff] }
 0x1cc   : > { %v1748_v49 = vadd.f32 %v1684_v29, %v1359_v10  ;;  %v1737_v37 = vadd.f32 %v1673_v21, %v1348_v1  ;;  %v5018_v18 = vld [vmem:[#allocation125_spill] sm:$0xff]  ;;  %v2264_v38 = vadd.f32 %v2200_v25, %v2136_v3  ;;  %v2074_v29 = vmul.f32 %v4069_v16, %v1879_v44  ;;  %v2190_v3 = vld [vmem:[%s4709_s2 + $0x48] sm:$0xff] }
 0x1cd   : > { %2342 = vxpose.xlu1.b32.cont [2/16] %v2262_v48, 128  ;;  %v2252_v48 = vadd.f32 %v2188_v61, %v2124_v15  ;;  %v1360_v15 = vmul.f32 %v5019_v40, %v5018_v18  ;;  %v5020_v6 = vld [vmem:[#allocation45_spill] sm:$0xff]  ;;  %v2253_v32 = vadd.f32 %v2189_v23, %v2125_v63  ;;  %v2063_v21 = vmul.f32 %v4069_v16, %v4082_v58  ;;  %v5024_v63 = vld [vmem:[#allocation120_spill] sm:$0xff] }
 0x1ce   : > { %2315 = vxpose.xlu0.b32.cont [7/16] %v2251_v11, 128  ;;  %v1674_v11 = vmul.f32 %v3854_v43, %v5017_v53  ;;  %v2137_v0 = vadd.f32 %v2073_v55, %v1748_v49  ;;  %v1349_v12 = vmul.f32 %v5021_v7, %v5020_v6  ;;  %v2126_v10 = vadd.f32 %v2062_v4, %v1737_v37  ;;  %v5023_v58 = vld [vmem:[#allocation57_spill] sm:$0xff]  ;;  %v5025_v23 = vld [vmem:[#allocation44_spill] sm:$0xff] }
 0x1cf   : > { %v1887_v5 = vpop.permute.xlu1 %1886  ;;  %v4201_v54 = vpop.permute.xlu0 %1898  ;;  %v1749_v55 = vadd.f32 %v1685_v46, %v1360_v15  ;;  %v1686_v44 = vmul.f32 %v3854_v43, %v3833_v36  ;;  %v1675_v1 = vmul.f32 %v3854_v43, %v5022_v47  ;;  %v2075_v25 = vmul.f32 %v4069_v16, %v4163_v39  ;;  %v5026_v37 = vld [vmem:[#allocation96_spill] sm:$0xff]  ;;  %v2202_v15 = vld [vmem:[%s4709_s2 + $0xa8] sm:$0xff] }
 0x1d0   : > { %v1738_v34 = vadd.f32 %v1674_v11, %v1349_v12  ;;  %v1350_v53 = vmul.f32 %v5026_v37, %v5025_v23  ;;  %v2254_v18 = vadd.f32 %v2190_v3, %v2126_v10  ;;  %v2064_v40 = vmul.f32 %v4069_v16, %v4104_v28  ;;  %v5027_v7 = vld [vmem:[#allocation56_spill] sm:$0xff]  ;;  %v5028_v28 = vld [vmem:[#allocation122_spill] sm:$0xff] }
 0x1d1   : > { %2343 = vxpose.xlu1.b32.cont [3/16] %v2263_v31, 128  ;;  %v2201_v31 = vld [vmem:[%s4709_s2 + $0xa0] sm:$0xff]  ;;  %v2138_v49 = vadd.f32 %v2074_v29, %v1749_v55  ;;  %v1687_v39 = vmul.f32 %v3854_v43, %v3835_v33  ;;  %v1676_v6 = vmul.f32 %v3854_v43, %v3801_v26  ;;  %v1362_v12 = vmul.f32 %v5028_v28, %v5027_v7  ;;  %v5029_v55 = vld [vmem:[#allocation103_spill] sm:$0xff]  ;;  %v5036_v28 = vld [vmem:[#allocation142_spill] sm:$0xff] }
 0x1d2   : > { %2316 = vxpose.xlu0.b32.cont [8/16] %v2252_v48, 128  ;;  %v1361_v48 = vmul.f32 %v5024_v63, %v5023_v58  ;;  %v2265_v4 = vadd.f32 %v2201_v31, %v2137_v0  ;;  %v2127_v11 = vadd.f32 %v2063_v21, %v1738_v34  ;;  %v1739_v29 = vadd.f32 %v1675_v1, %v1350_v53  ;;  %v2203_v1 = vld [vmem:[%s4709_s2 + $0xb0] sm:$0xff]  ;;  %v2192_v63 = vld [vmem:[%s4709_s2 + $0x58] sm:$0xff] }
 0x1d3   : > { %v4220_v61 = vpop.permute.xlu1 %1894  ;;  %v4222_v27 = vpop.permute.xlu0 %1906  ;;  %v2266_v21 = vadd.f32 %v2202_v15, %v2138_v49  ;;  %v2076_v10 = vmul.f32 %v4069_v16, %v1887_v5  ;;  %v2065_v47 = vmul.f32 %v4069_v16, %v4094_v62  ;;  %v1751_v58 = vadd.f32 %v1687_v39, %v1362_v12  ;;  %v5032_v62 = vld [vmem:[#allocation129_spill] sm:$0xff]  ;;  %v5033_v49 = vld [vmem:[#allocation59_spill] sm:$0xff]  ;;  %v5035_v15 = vld [vmem:[#allocation46_spill] sm:$0xff] }
 0x1d4   : > { %v1750_v0 = vadd.f32 %v1686_v44, %v1361_v48  ;;  %v5030_v44 = vld [vmem:[#allocation47_spill] sm:$0xff]  ;;  %v2128_v26 = vadd.f32 %v2064_v40, %v1739_v29  ;;  %v1688_v5 = vmul.f32 %v3854_v43, %v3839_v42  ;;  %v1363_v23 = vmul.f32 %v5033_v49, %v5032_v62  ;;  %v5034_v40 = vld [vmem:[#allocation108_spill] sm:$0xff]  ;;  %v2193_v12 = vld [vmem:[%s4709_s2 + $0x60] sm:$0xff] }
 0x1d5   : > { %2344 = vxpose.xlu1.b32.cont [4/16] %v2264_v38, 128  ;;  %v2191_v38 = vld [vmem:[%s4709_s2 + $0x50] sm:$0xff]  ;;  %v1351_v3 = vmul.f32 %v5030_v44, %v5029_v55  ;;  %v2077_v53 = vmul.f32 %v4069_v16, %v4182_v30  ;;  %v2066_v29 = vmul.f32 %v4069_v16, %v4116_v52  ;;  %v1689_v30 = vmul.f32 %v3854_v43, %v5036_v28  ;;  %v5038_v55 = vld [vmem:[#allocation134_spill] sm:$0xff]  ;;  %v2205_v62 = vld [vmem:[%s4709_s2 + $0xc0] sm:$0xff] }
 0x1d6   : > { %2317 = vxpose.xlu0.b32.cont [9/16] %v2253_v32, 128  ;;  %v2139_v32 = vadd.f32 %v2075_v25, %v1750_v0  ;;  %v2255_v34 = vadd.f32 %v2191_v38, %v2127_v11  ;;  %v2140_v11 = vadd.f32 %v2076_v10, %v1751_v58  ;;  %v1352_v0 = vmul.f32 %v5035_v15, %v5034_v40  ;;  %v5039_v52 = vld [vmem:[#allocation58_spill] sm:$0xff]  ;;  %v5040_v58 = vld [vmem:[#allocation49_spill] sm:$0xff]  ;;  %v5045_v15 = vld [vmem:[#allocation128_spill] sm:$0xff] }
 0x1d7   : > { %v4242_v46 = vpop.permute.xlu1 %1902  ;;  %v4244_v36 = vpop.permute.xlu0 %1914  ;;  %v1740_v48 = vadd.f32 %v1676_v6, %v1351_v3  ;;  %v2256_v38 = vadd.f32 %v2192_v63, %v2128_v26  ;;  %v2204_v6 = vld [vmem:[%s4709_s2 + $0xb8] sm:$0xff]  ;;  %v1752_v7 = vadd.f32 %v1688_v5, %v1363_v23  ;;  %v1364_v44 = vmul.f32 %v5039_v52, %v5038_v55  ;;  %v5041_v5 = vld [vmem:[#allocation101_spill] sm:$0xff]  ;;  %v5042_v23 = vld [vmem:[#allocation143_spill] sm:$0xff] }
 0x1d8   : > { %v2267_v37 = vadd.f32 %v2203_v1, %v2139_v32  ;;  %v1353_v63 = vmul.f32 %v5041_v5, %v5040_v58  ;;  %v5046_v28 = vld [vmem:[#allocation48_spill] sm:$0xff]  ;;  %v2206_v55 = vld [vmem:[%s4709_s2 + $0xc8] sm:$0xff] }
 0x1d9   : > { %2345 = vxpose.xlu1.b32.cont [5/16] %v2265_v4, 128  ;;  %v5031_v4 = vld [vmem:[#allocation139_spill] sm:$0xff]  ;;  %v2129_v39 = vadd.f32 %v2065_v47, %v1740_v48  ;;  %v2141_v3 = vadd.f32 %v2077_v53, %v1752_v7  ;;  %v2078_v47 = vmul.f32 %v4069_v16, %v4220_v61  ;;  %v1753_v49 = vadd.f32 %v1689_v30, %v1364_v44  ;;  %v2194_v61 = vld [vmem:[%s4709_s2 + $0x68] sm:$0xff]  ;;  %v5048_v44 = vld [vmem:[#allocation144_spill] sm:$0xff] }
 0x1da   : > { %2318 = vxpose.xlu0.b32.cont [10/16] %v2254_v18, 128  ;;  %v1677_v25 = vmul.f32 %v3854_v43, %v5031_v4  ;;  %v2067_v4 = vmul.f32 %v4069_v16, %v4106_v60  ;;  %v5044_v60 = vld [vmem:[#allocation61_spill] sm:$0xff]  ;;  %v5047_v30 = vld [vmem:[#allocation106_spill] sm:$0xff] }
 0x1db   : > { %v4263_v31 = vpop.permute.xlu1 %1910  ;;  %v4265_v33 = vpop.permute.xlu0 %1922  ;;  %v2257_v48 = vadd.f32 %v2193_v12, %v2129_v39  ;;  %v2269_v39 = vadd.f32 %v2205_v62, %v2141_v3  ;;  %v1354_v12 = vmul.f32 %v5047_v30, %v5046_v28  ;;  %v2195_v3 = vld [vmem:[%s4709_s2 + $0x70] sm:$0xff]  ;;  %v5050_v58 = vld [vmem:[#allocation130_spill] sm:$0xff] }
 0x1dc   : > { %v1741_v32 = vadd.f32 %v1677_v25, %v1352_v0  ;;  %v1365_v0 = vmul.f32 %v5045_v15, %v5044_v60 }
 0x1dd   : > { %2346 = vxpose.xlu1.b32.cont [6/16] %v2266_v21, 128  ;;  %v5037_v21 = vld [vmem:[#allocation140_spill] sm:$0xff] }
 0x1de   : > { %2319 = vxpose.xlu0.b32.cont [11/16] %v2255_v34, 128  ;;  %v1678_v10 = vmul.f32 %v3854_v43, %v5037_v21  ;;  %v2268_v34 = vadd.f32 %v2204_v6, %v2140_v11  ;;  %v2130_v25 = vadd.f32 %v2066_v29, %v1741_v32  ;;  %v5043_v11 = vld [vmem:[#allocation141_spill] sm:$0xff]  ;;  %v2142_v29 = vadd.f32 %v2078_v47, %v1753_v49  ;;  %v5049_v47 = vld [vmem:[#allocation60_spill] sm:$0xff] }
 0x1df   : > { %v4285_v18 = vpop.permute.xlu1 %1918  ;;  %v4287_v42 = vpop.permute.xlu0 %1930  ;;  %v1679_v40 = vmul.f32 %v3854_v43, %v5043_v11  ;;  %v1366_v5 = vmul.f32 %v5050_v58, %v5049_v47  ;;  %v5051_v11 = vld [vmem:[#allocation138_spill] sm:$0xff]  ;;  %v5054_v47 = vld [vmem:[#allocation137_spill] sm:$0xff] }
 0x1e0   : > { %v1742_v53 = vadd.f32 %v1678_v10, %v1353_v63  ;;  %v2258_v21 = vadd.f32 %v2194_v61, %v2130_v25  ;;  %v2068_v10 = vmul.f32 %v4069_v16, %v4131_v45  ;;  %v2270_v45 = vadd.f32 %v2206_v55, %v2142_v29 }
 0x1e1   : > { %2347 = vxpose.xlu1.b32.cont [7/16] %v2267_v37, 128  ;;  %v1690_v37 = vmul.f32 %v3854_v43, %v5042_v23  ;;  %v2207_v23 = vld [vmem:[%s4709_s2 + $0xd0] sm:$0xff] }
 0x1e2   : > { %2320 = vxpose.xlu0.b32.cont [12/16] %v2256_v38, 128  ;;  %v2079_v38 = vmul.f32 %v4069_v16, %v4201_v54  ;;  %v2131_v32 = vadd.f32 %v2067_v4, %v1742_v53  ;;  %v1691_v54 = vmul.f32 %v3854_v43, %v5048_v44  ;;  %v1692_v53 = vmul.f32 %v3854_v43, %v3856_v50  ;;  %v2208_v50 = vld [vmem:[%s4709_s2 + $0xd8] sm:$0xff] }
 0x1e3   : > { %v1927_v26 = vpop.permute.xlu1 %1926  ;;  %v4307_v1 = vpop.permute.xlu0 %1938  ;;  %v1754_v52 = vadd.f32 %v1690_v37, %v1365_v0  ;;  %v2085_v37 = vmul.f32 %v4069_v16, %v4265_v33  ;;  %v2081_v0 = vmul.f32 %v4069_v16, %v4222_v27  ;;  %v2087_v44 = vmul.f32 %v4069_v16, %v4287_v42 }
 0x1e4   : > { %v2259_v62 = vadd.f32 %v2195_v3, %v2131_v32  ;;  %v1755_v61 = vadd.f32 %v1691_v54, %v1366_v5  ;;  %v2086_v30 = vmul.f32 %v4069_v16, %v1927_v26  ;;  %v2213_v32 = vld [vmem:[%s4709_s2 + $0x100] sm:$0xff]  ;;  %v1694_v3 = vmul.f32 %v3854_v43, %v3864_v51  ;;  %v2210_v43 = vld [vmem:[%s4709_s2 + $0xe8] sm:$0xff] }
 0x1e5   : > { %2348 = vxpose.xlu1.b32.cont [8/16] %v2268_v34, 128  ;;  %v1743_v34 = vadd.f32 %v1679_v40, %v1354_v12  ;;  %v2143_v63 = vadd.f32 %v2079_v38, %v1754_v52  ;;  %v5052_v40 = vld [vmem:[#allocation62_spill] sm:$0xff]  ;;  %v2149_v28 = vadd.f32 %v2085_v37, %v3880_v35  ;;  %v2209_v35 = vld [vmem:[%s4709_s2 + $0xe0] sm:$0xff]  ;;  %v2151_v51 = vadd.f32 %v2087_v44, %v3892_v14  ;;  %v2211_v14 = vld [vmem:[%s4709_s2 + $0xf0] sm:$0xff] }
 0x1e6   : > { %2321 = vxpose.xlu0.b32.cont [13/16] %v2257_v48, 128  ;;  %v2080_v48 = vmul.f32 %v4069_v16, %v4242_v46  ;;  %v2196_v46 = vld [vmem:[%s4709_s2 + $0x78] sm:$0xff]  ;;  %v1367_v60 = vmul.f32 %v5052_v40, %v5051_v11  ;;  %v2150_v54 = vadd.f32 %v2086_v30, %v3882_v8  ;;  %v2084_v37 = vmul.f32 %v4069_v16, %v4285_v18 }
 0x1e7   : > { %v4327_v6 = vpop.permute.xlu1 %1934  ;;  %v4329_v7 = vpop.permute.xlu0 %1946  ;;  %v2132_v49 = vadd.f32 %v2068_v10, %v1743_v34  ;;  %v2271_v15 = vadd.f32 %v2207_v23, %v2143_v63  ;;  %v2082_v10 = vmul.f32 %v4069_v16, %v4263_v31  ;;  %v2277_v26 = vadd.f32 %v2213_v32, %v2149_v28  ;;  %v2214_v31 = vld [vmem:[%s4709_s2 + $0x108] sm:$0xff]  ;;  %v5053_v34 = vld [vmem:[#allocation63_spill] sm:$0xff]  ;;  %v2216_v40 = vld [vmem:[%s4709_s2 + $0x118] sm:$0xff] }
 0x1e8   : > { %v1756_v12 = vadd.f32 %v1692_v53, %v1367_v60  ;;  %v1369_v58 = vmul.f32 %v5054_v47, %v5053_v34  ;;  %v2083_v63 = vmul.f32 %v4069_v16, %v4244_v36  ;;  %v2215_v36 = vld [vmem:[%s4709_s2 + $0x110] sm:$0xff]  ;;  %v2148_v60 = vadd.f32 %v2084_v37, %v3870_v9 }
 0x1e9   : > { %2349 = vxpose.xlu1.b32.cont [9/16] %v2269_v39, 128  ;;  %v2144_v39 = vadd.f32 %v2080_v48, %v1755_v61  ;;  %v2260_v29 = vadd.f32 %v2196_v46, %v2132_v49  ;;  %v2146_v42 = vadd.f32 %v2082_v10, %v3862_v41  ;;  %v2278_v48 = vadd.f32 %v2214_v31, %v2150_v54  ;;  %v2218_v10 = vld [vmem:[%s4709_s2 + $0x128] sm:$0xff]  ;;  %v2219_v31 = vld [vmem:[%s4709_s2 + $0x130] sm:$0xff] }
 0x1ea   : > { %2322 = vxpose.xlu0.b32.cont [14/16] %v2258_v21, 128  ;;  %v2145_v27 = vadd.f32 %v2081_v0, %v1756_v12  ;;  %v1758_v49 = vadd.f32 %v1694_v3, %v1369_v58  ;;  %v2279_v53 = vadd.f32 %v2215_v36, %v2151_v51  ;;  %v2091_v32 = vmul.f32 %v4069_v16, %v4329_v7  ;;  %v2230_v54 = vld [vmem:[%s4709_s2 + $0x188] sm:$0xff]  ;;  %v2221_v36 = vld [vmem:[%s4709_s2 + $0x140] sm:$0xff] }
 0x1eb   : > { %v4347_v4 = vpop.permute.xlu1 %1942  ;;  %v4349_v25 = vpop.permute.xlu0 %1954  ;;  %v2272_v21 = vadd.f32 %v2208_v50, %v2144_v39  ;;  %v2274_v23 = vadd.f32 %v2210_v43, %v2146_v42  ;;  %v2217_v50 = vld [vmem:[%s4709_s2 + $0x120] sm:$0xff]  ;;  %v2220_v42 = vld [vmem:[%s4709_s2 + $0x138] sm:$0xff] }
 0x1ec   : > { %v2273_v5 = vadd.f32 %v2209_v35, %v2145_v27  ;;  %v2147_v41 = vadd.f32 %v2083_v63, %v1758_v49 }
 0x1ed   : > { %2350 = vxpose.xlu1.b32.cont [10/16] %v2270_v45, 128 }
 0x1ee   : > { %2323 = vxpose.xlu0.b32.cont [15/16] %v2259_v62, 128  ;;  %v2088_v62 = vmul.f32 %v4069_v16, %v4327_v6  ;;  %v2089_v6 = vmul.f32 %v4069_v16, %v4307_v1  ;;  %v2275_v18 = vadd.f32 %v2211_v14, %v2147_v41  ;;  %v2212_v1 = vld [vmem:[%s4709_s2 + $0xf8] sm:$0xff]  ;;  %v5055_v41 = vld [vmem:[#allocation9_spill] sm:$0xff] }
 0x1ef   : > { %v4365_v38 = vpop.permute.xlu1 %1950  ;;  %v4367_v33 = vpop.permute.xlu0 %1962  ;;  %v2276_v9 = vadd.f32 %v2212_v1, %v2148_v60  ;;  %v5056_v14 = vld [vmem:[#allocation5_spill] sm:$0xff]  ;;  %v5057_v60 = vld [vmem:[#allocation67_spill] sm:$0xff]  ;;  %v5058_v1 = vld [vmem:[#allocation6_spill] sm:$0xff] }
 0x1f0   : > { %v2152_v46 = vadd.f32 %v2088_v62, %v3894_v2  ;;  %v2153_v2 = vadd.f32 %v2089_v6, %v3904_v17  ;;  %v2092_v44 = vmul.f32 %v4069_v16, %v4365_v38  ;;  %v2093_v38 = vmul.f32 %v4069_v16, %v4349_v25  ;;  %v2232_v62 = vld [vmem:[%s4709_s2 + $0x198] sm:$0xff]  ;;  %v2233_v6 = vld [vmem:[%s4709_s2 + $0x1a0] sm:$0xff] }
 0x1f1   : > { %2351 = vxpose.xlu1.b32.cont [11/16] %v2271_v15, 128 }
 0x1f2   : > { %2324 = vxpose.xlu0.b32.end [16/16] %v2260_v29, 128  ;;  %v2280_v39 = vadd.f32 %v2216_v40, %v2152_v46  ;;  %v2090_v29 = vmul.f32 %v4069_v16, %v4347_v4  ;;  %v2281_v12 = vadd.f32 %v2217_v50, %v2153_v2  ;;  %v2229_v4 = vld [vmem:[%s4709_s2 + $0x180] sm:$0xff]  ;;  %v2156_v58 = vadd.f32 %v2092_v44, %v3918_v20  ;;  %v5062_v44 = vld [vmem:[#allocation7_spill] sm:$0xff] }
 0x1f3   : > { %v4379_v55 = vpop.permute.xlu1 %1958  ;;  %v4381_v52 = vpop.permute.xlu0 %1970  ;;  %v2157_v25 = vadd.f32 %v2093_v38, %v3928_v24 }
 0x1f4   : > { %v2154_v17 = vadd.f32 %v2090_v29, %v3906_v19  ;;  %v2155_v19 = vadd.f32 %v2091_v32, %v3916_v22  ;;  %v2094_v20 = vmul.f32 %v4069_v16, %v4379_v55  ;;  %v2095_v55 = vmul.f32 %v4069_v16, %v4367_v33  ;;  %v2234_v29 = vld [vmem:[%s4709_s2 + $0x1a8] sm:$0xff] }
 0x1f5   : > { %2352 = vxpose.xlu1.b32.cont [12/16] %v2272_v21, 128  ;;  %v2285_v37 = vadd.f32 %v2221_v36, %v2157_v25 }
 0x1f6   : > { %2373 = vxpose.xlu0.b32.start [1/16] %v2277_v26, 128  ;;  %v2282_v26 = vadd.f32 %v2218_v10, %v2154_v17  ;;  %v2283_v47 = vadd.f32 %v2219_v31, %v2155_v19  ;;  %v2159_v33 = vadd.f32 %v2095_v55, %v5058_v1  ;;  %v5061_v19 = vld [vmem:[#allocation68_spill] sm:$0xff]  ;;  %v5069_v1 = vld [vmem:[#allocation69_spill] sm:$0xff] }
 0x1f7   : > { %v4399_v45 = vpop.permute.xlu1 %1966  ;;  %v4401_v8 = vpop.permute.xlu0 %1978  ;;  %v2236_v31 = vld [vmem:[%s4709_s2 + $0x1b8] sm:$0xff] }
 0x1f9   : > { %2353 = vxpose.xlu1.b32.cont [13/16] %v2273_v5, 128  ;;  %v2231_v5 = vld [vmem:[%s4709_s2 + $0x190] sm:$0xff] }
 0x1fa   : > { %2374 = vxpose.xlu0.b32.cont [2/16] %v2278_v48, 128  ;;  %v2284_v48 = vadd.f32 %v2220_v42, %v2156_v58 }
 0x1fb   : > { %v4414_v61 = vpop.permute.xlu1 %1974  ;;  %v1987_v11 = vpop.permute.xlu0 %1986 }
 0x1fc   : > { %v2101_v15 = vmul.f32 %v4069_v16, %v1987_v11  ;;  %v2222_v11 = vld [vmem:[%s4709_s2 + $0x148] sm:$0xff] }
 0x1fd   : > { %2354 = vxpose.xlu1.b32.cont [14/16] %v2274_v23, 128 }
 0x1fe   : > { %2375 = vxpose.xlu0.b32.cont [3/16] %v2279_v53, 128  ;;  %v2165_v28 = vadd.f32 %v2101_v15, %v3976_v56  ;;  %v2158_v53 = vadd.f32 %v2094_v20, %v5056_v14  ;;  %v5065_v20 = vld [vmem:[#allocation70_spill] sm:$0xff] }
 0x1ff   : > { %v4427_v0 = vpop.permute.xlu1 %1982  ;;  %v1995_v27 = vpop.permute.xlu0 %1994 }
 0x200   : > { %v2293_v56 = vadd.f32 %v2229_v4, %v2165_v28  ;;  %v2103_v35 = vmul.f32 %v4069_v16, %v1995_v27  ;;  %v2286_v2 = vadd.f32 %v2222_v11, %v2158_v53  ;;  %v5059_v28 = vld [vmem:[#allocation10_spill] sm:$0xff]  ;;  %v5060_v4 = vld [vmem:[#allocation64_spill] sm:$0xff]  ;;  %v2239_v11 = vld [vmem:[%s4709_s2 + $0x1d0] sm:$0xff] }
 0x201   : > { %2355 = vxpose.xlu1.b32.cont [15/16] %v2275_v18, 128 }
 0x202   : > { %2376 = vxpose.xlu0.b32.cont [4/16] %v2280_v39, 128  ;;  %v2167_v34 = vadd.f32 %v2103_v35, %v3988_v57  ;;  %v2096_v39 = vmul.f32 %v4069_v16, %v4399_v45  ;;  %v2097_v45 = vmul.f32 %v4069_v16, %v4381_v52 }
 0x203   : > { %v1991_v30 = vpop.permute.xlu1 %1990  ;;  %v2003_v63 = vpop.permute.xlu0 %2002 }
 0x204   : > { %v2102_v21 = vmul.f32 %v4069_v16, %v1991_v30  ;;  %v2295_v57 = vadd.f32 %v2231_v5, %v2167_v34  ;;  %v2105_v43 = vmul.f32 %v4069_v16, %v2003_v63  ;;  %v2160_v27 = vadd.f32 %v2096_v39, %v5060_v4  ;;  %v5064_v63 = vld [vmem:[#allocation65_spill] sm:$0xff]  ;;  %v2240_v39 = vld [vmem:[%s4709_s2 + $0x1d8] sm:$0xff] }
 0x205   : > { %2356 = vxpose.xlu1.b32.end [16/16] %v2276_v9, 128  ;;  %v2223_v9 = vld [vmem:[%s4709_s2 + $0x150] sm:$0xff]  ;;  %v2161_v52 = vadd.f32 %v2097_v45, %v5062_v44 }
 0x206   : > { %2377 = vxpose.xlu0.b32.cont [5/16] %v2281_v12, 128  ;;  %v2166_v7 = vadd.f32 %v2102_v21, %v3978_v59  ;;  %v2169_v23 = vadd.f32 %v2105_v43, %v5055_v41  ;;  %v2287_v17 = vadd.f32 %v2223_v9, %v2159_v33  ;;  %v2235_v21 = vld [vmem:[%s4709_s2 + $0x1b0] sm:$0xff]  ;;  %v2100_v41 = vmul.f32 %v4069_v16, %v4427_v0  ;;  %v5068_v0 = vld [vmem:[#allocation66_spill] sm:$0xff]  ;;  %v5070_v9 = vld [vmem:[#allocation97_spill] sm:$0xff] }
 0x207   : > { %v1999_v3 = vpop.permute.xlu1 %1998  ;;  %v2011_v46 = vpop.permute.xlu0 %2010 }
 0x208   : > { %v2294_v59 = vadd.f32 %v2230_v54, %v2166_v7  ;;  %v2104_v22 = vmul.f32 %v4069_v16, %v1999_v3  ;;  %v2297_v40 = vadd.f32 %v2233_v6, %v2169_v23  ;;  %v2107_v18 = vmul.f32 %v4069_v16, %v2011_v46  ;;  %v2238_v23 = vld [vmem:[%s4709_s2 + $0x1c8] sm:$0xff] }
 0x209   : > { %2405 = vxpose.xlu1.b32.start [1/16] %v2293_v56, 128  ;;  %v2224_v56 = vld [vmem:[%s4709_s2 + $0x158] sm:$0xff]  ;;  %v2098_v3 = vmul.f32 %v4069_v16, %v4414_v61  ;;  %v2099_v61 = vmul.f32 %v4069_v16, %v4401_v8  ;;  %v2164_v46 = vadd.f32 %v2100_v41, %v5068_v0 }
 0x20a   : > { %2378 = vxpose.xlu0.b32.cont [6/16] %v2282_v26, 128  ;;  %v2168_v51 = vadd.f32 %v2104_v22, %v3990_v13  ;;  %v2171_v30 = vadd.f32 %v2107_v18, %v5059_v28  ;;  %v2288_v54 = vadd.f32 %v2224_v56, %v2160_v27  ;;  %v5063_v22 = vld [vmem:[#allocation11_spill] sm:$0xff]  ;;  %v2228_v18 = vld [vmem:[%s4709_s2 + $0x178] sm:$0xff] }
 0x20b   : > { %v2007_v49 = vpop.permute.xlu1 %2006  ;;  %v2019_v10 = vpop.permute.xlu0 %2018  ;;  %v2162_v42 = vadd.f32 %v2098_v3, %v5064_v63  ;;  %v5071_v27 = vld [vmem:[#allocation12_spill] sm:$0xff] }
 0x20c   : > { %v2296_v13 = vadd.f32 %v2232_v62, %v2168_v51  ;;  %v2106_v24 = vmul.f32 %v4069_v16, %v2007_v49  ;;  %v2299_v35 = vadd.f32 %v2235_v21, %v2171_v30  ;;  %v2109_v7 = vmul.f32 %v4069_v16, %v2019_v10  ;;  %v2226_v51 = vld [vmem:[%s4709_s2 + $0x168] sm:$0xff]  ;;  %v5066_v49 = vld [vmem:[#allocation8_spill] sm:$0xff] }
 0x20d   : > { %2406 = vxpose.xlu1.b32.cont [2/16] %v2294_v59, 128  ;;  %v2225_v59 = vld [vmem:[%s4709_s2 + $0x160] sm:$0xff]  ;;  %v2163_v8 = vadd.f32 %v2099_v61, %v5066_v49  ;;  %v2290_v36 = vadd.f32 %v2226_v51, %v2162_v42  ;;  %v2242_v10 = vld [vmem:[%s4709_s2 + $0x1e8] sm:$0xff] }
 0x20e   : > { %2379 = vxpose.xlu0.b32.cont [7/16] %v2283_v47, 128  ;;  %v2170_v15 = vadd.f32 %v2106_v24, %v5057_v60  ;;  %v2173_v47 = vadd.f32 %v2109_v7, %v5063_v22  ;;  %v2289_v5 = vadd.f32 %v2225_v59, %v2161_v52  ;;  %v2227_v24 = vld [vmem:[%s4709_s2 + $0x170] sm:$0xff]  ;;  %v2244_v59 = vld [vmem:[%s4709_s2 + $0x1f8] sm:$0xff] }
 0x20f   : > { %v2015_v50 = vpop.permute.xlu1 %2014  ;;  %v2027_v43 = vpop.permute.xlu0 %2026  ;;  %v2291_v6 = vadd.f32 %v2227_v24, %v2163_v8  ;;  %v5072_v7 = vld [vmem:[#allocation15_spill] sm:$0xff] }
 0x210   : > { %v2298_v12 = vadd.f32 %v2234_v29, %v2170_v15  ;;  %v2108_v32 = vmul.f32 %v4069_v16, %v2015_v50  ;;  %v2243_v52 = vld [vmem:[%s4709_s2 + $0x1f0] sm:$0xff] }
 0x211   : > { %2407 = vxpose.xlu1.b32.cont [3/16] %v2295_v57, 128  ;;  %v2237_v57 = vld [vmem:[%s4709_s2 + $0x1c0] sm:$0xff] }
 0x212   : > { %2380 = vxpose.xlu0.b32.cont [8/16] %v2284_v48, 128  ;;  %v2172_v26 = vadd.f32 %v2108_v32, %v5061_v19  ;;  %v2301_v25 = vadd.f32 %v2237_v57, %v2173_v47  ;;  %v2111_v48 = vmul.f32 %v4069_v16, %v2027_v43  ;;  %v2241_v32 = vld [vmem:[%s4709_s2 + $0x1e0] sm:$0xff] }
 0x213   : > { %v2023_v34 = vpop.permute.xlu1 %2022 }
 0x214   : > { %v2300_v38 = vadd.f32 %v2236_v31, %v2172_v26  ;;  %v2110_v58 = vmul.f32 %v4069_v16, %v2023_v34  ;;  %v5073_v31 = vld [vmem:[#allocation72_spill] sm:$0xff] }
 0x215   : > { %2408 = vxpose.xlu1.b32.cont [4/16] %v2296_v13, 128 }
 0x216   : > { %2381 = vxpose.xlu0.b32.cont [9/16] %v2285_v37, 128  ;;  %v2174_v62 = vadd.f32 %v2110_v58, %v5065_v20  ;;  %v5067_v37 = vld [vmem:[#allocation92_spill] sm:$0xff] }
 0x217   : > { %v2031_v13 = vpop.permute.xlu1 %2030  ;;  %v2175_v55 = vadd.f32 %v2111_v48, %v5067_v37 }
 0x218   : > { %v2302_v14 = vadd.f32 %v2238_v23, %v2174_v62  ;;  %v2112_v53 = vmul.f32 %v4069_v16, %v2031_v13 }
 0x219   : > { %2409 = vxpose.xlu1.b32.cont [5/16] %v2297_v40, 128  ;;  %v2035_v40 = vpop.permute.xlu0 %2034  ;;  %v2303_v60 = vadd.f32 %v2239_v11, %v2175_v55 }
 0x21a   : > { %2382 = vxpose.xlu0.b32.cont [10/16] %v2286_v2, 128  ;;  %v2113_v15 = vmul.f32 %v4069_v16, %v2035_v40  ;;  %v2176_v33 = vadd.f32 %v2112_v53, %v5069_v1  ;;  %v2292_v2 = vadd.f32 %v2228_v18, %v2164_v46 }
 0x21b   : > { %v2039_v29 = vpop.permute.xlu1 %2038 }
 0x21c   : > { %v2177_v28 = vadd.f32 %v2113_v15, %v5070_v9  ;;  %v2304_v30 = vadd.f32 %v2240_v39, %v2176_v33 }
 0x21d   : > { %2410 = vxpose.xlu1.b32.cont [6/16] %v2298_v12, 128  ;;  %v2043_v50 = vpop.permute.xlu0 %2042  ;;  %v2114_v12 = vmul.f32 %v4069_v16, %v2039_v29 }
 0x21e   : > { %2383 = vxpose.xlu0.b32.cont [11/16] %v2287_v17, 128  ;;  %v2305_v45 = vadd.f32 %v2241_v32, %v2177_v28  ;;  %v2115_v4 = vmul.f32 %v4069_v16, %v2043_v50 }
 0x21f   : > { %v2178_v21 = vadd.f32 %v2114_v12, %v5071_v27  ;;  %v2047_v56 = vpop.permute.xlu1 %2046 }
 0x220   : > { %v2179_v19 = vadd.f32 %v2115_v4, %v5072_v7  ;;  %v2116_v44 = vmul.f32 %v4069_v16, %v2047_v56 }
 0x221   : > { %2411 = vxpose.xlu1.b32.cont [7/16] %v2299_v35, 128  ;;  %v2306_v26 = vadd.f32 %v2242_v10, %v2178_v21 }
 0x222   : > { %2384 = vxpose.xlu0.b32.cont [12/16] %v2288_v54, 128  ;;  %v2307_v3 = vadd.f32 %v2243_v52, %v2179_v19  ;;  %v2180_v34 = vadd.f32 %v2116_v44, %v5073_v31 }
 0x224   : > { %v2308_v22 = vadd.f32 %v2244_v59, %v2180_v34 }
 0x225   : > { %2412 = vxpose.xlu1.b32.cont [8/16] %v2300_v38, 128 }
 0x226   : > { %2385 = vxpose.xlu0.b32.cont [13/16] %v2289_v5, 128 }
 0x229   : > { %2413 = vxpose.xlu1.b32.cont [9/16] %v2301_v25, 128 }
 0x22a   : > { %2386 = vxpose.xlu0.b32.cont [14/16] %v2290_v36, 128 }
 0x22d   : > { %2414 = vxpose.xlu1.b32.cont [10/16] %v2302_v14, 128 }
 0x22e   : > { %2387 = vxpose.xlu0.b32.cont [15/16] %v2291_v6, 128 }
 0x231   : > { %2415 = vxpose.xlu1.b32.cont [11/16] %v2303_v60, 128 }
 0x232   : > { %2388 = vxpose.xlu0.b32.end [16/16] %v2292_v2, 128 }
 0x235   : > { %2416 = vxpose.xlu1.b32.cont [12/16] %v2304_v30, 128 }
 0x236   : > { %v2325_v17 = vpop.trf.xlu0 }
 0x237   : > { %2437 = vst [vmem:[%s4572_s17] sm:$0xff] %v2325_v17 }
 0x239   : > { %2417 = vxpose.xlu1.b32.cont [13/16] %v2305_v45, 128 }
 0x23a   : > { %v2326_v35 = vpop.trf.xlu0 }
 0x23b   : > { %2441 = vst [vmem:[%s4572_s17 + $0x20] sm:$0xff] %v2326_v35 }
 0x23d   : > { %2418 = vxpose.xlu1.b32.cont [14/16] %v2306_v26, 128 }
 0x23e   : > { %v2327_v54 = vpop.trf.xlu0 }
 0x23f   : > { %2445 = vst [vmem:[%s4572_s17 + $0x40] sm:$0xff] %v2327_v54 }
 0x241   : > { %2419 = vxpose.xlu1.b32.cont [15/16] %v2307_v3, 128 }
 0x242   : > { %v2328_v16 = vpop.trf.xlu0 }
 0x243   : > { %2449 = vst [vmem:[%s4572_s17 + $0x60] sm:$0xff] %v2328_v16 }
 0x245   : > { %2420 = vxpose.xlu1.b32.end [16/16] %v2308_v22, 128 }
 0x246   : > { %v2329_v47 = vpop.trf.xlu0 }
 0x247   : > { %2453 = vst [vmem:[%s4572_s17 + $0x80] sm:$0xff] %v2329_v47 }
 0x249   : > { %v2357_v38 = vpop.trf.xlu1 }
 0x24a   : > { %2438 = vst [vmem:[%s4572_s17 + $0x8] sm:$0xff] %v2357_v38  ;;  %v2330_v58 = vpop.trf.xlu0 }
 0x24b   : > { %2457 = vst [vmem:[%s4572_s17 + $0xa0] sm:$0xff] %v2330_v58 }
 0x24d   : > { %v2358_v5 = vpop.trf.xlu1 }
 0x24e   : > { %2442 = vst [vmem:[%s4572_s17 + $0x28] sm:$0xff] %v2358_v5  ;;  %v2331_v61 = vpop.trf.xlu0 }
 0x24f   : > { %2461 = vst [vmem:[%s4572_s17 + $0xc0] sm:$0xff] %v2331_v61 }
 0x251   : > { %v2359_v63 = vpop.trf.xlu1 }
 0x252   : > { %2446 = vst [vmem:[%s4572_s17 + $0x48] sm:$0xff] %v2359_v63  ;;  %v2332_v42 = vpop.trf.xlu0 }
 0x253   : > { %2465 = vst [vmem:[%s4572_s17 + $0xe0] sm:$0xff] %v2332_v42 }
 0x255   : > { %v2360_v57 = vpop.trf.xlu1 }
 0x256   : > { %2450 = vst [vmem:[%s4572_s17 + $0x68] sm:$0xff] %v2360_v57  ;;  %v2333_v43 = vpop.trf.xlu0 }
 0x257   : > { %2469 = vst [vmem:[%s4572_s17 + $0x100] sm:$0xff] %v2333_v43 }
 0x259   : > { %v2361_v51 = vpop.trf.xlu1 }
 0x25a   : > { %2454 = vst [vmem:[%s4572_s17 + $0x88] sm:$0xff] %v2361_v51  ;;  %v2334_v25 = vpop.trf.xlu0 }
 0x25b   : > { %2473 = vst [vmem:[%s4572_s17 + $0x120] sm:$0xff] %v2334_v25 }
 0x25d   : > { %v2362_v48 = vpop.trf.xlu1 }
 0x25e   : > { %2458 = vst [vmem:[%s4572_s17 + $0xa8] sm:$0xff] %v2362_v48  ;;  %v2335_v20 = vpop.trf.xlu0 }
 0x25f   : > { %2477 = vst [vmem:[%s4572_s17 + $0x140] sm:$0xff] %v2335_v20 }
 0x261   : > { %v2363_v62 = vpop.trf.xlu1 }
 0x262   : > { %2462 = vst [vmem:[%s4572_s17 + $0xc8] sm:$0xff] %v2363_v62  ;;  %v2336_v49 = vpop.trf.xlu0 }
 0x263   : > { %2481 = vst [vmem:[%s4572_s17 + $0x160] sm:$0xff] %v2336_v49 }
 0x265   : > { %v2364_v8 = vpop.trf.xlu1 }
 0x266   : > { %2466 = vst [vmem:[%s4572_s17 + $0xe8] sm:$0xff] %v2364_v8  ;;  %v2337_v36 = vpop.trf.xlu0 }
 0x267   : > { %2485 = vst [vmem:[%s4572_s17 + $0x180] sm:$0xff] %v2337_v36 }
 0x269   : > { %v2365_v41 = vpop.trf.xlu1 }
 0x26a   : > { %2470 = vst [vmem:[%s4572_s17 + $0x108] sm:$0xff] %v2365_v41  ;;  %v2338_v23 = vpop.trf.xlu0 }
 0x26b   : > { %2489 = vst [vmem:[%s4572_s17 + $0x1a0] sm:$0xff] %v2338_v23 }
 0x26d   : > { %v2366_v13 = vpop.trf.xlu1 }
 0x26e   : > { %2474 = vst [vmem:[%s4572_s17 + $0x128] sm:$0xff] %v2366_v13  ;;  %v2339_v24 = vpop.trf.xlu0 }
 0x26f   : > { %2493 = vst [vmem:[%s4572_s17 + $0x1c0] sm:$0xff] %v2339_v24 }
 0x271   : > { %v2367_v37 = vpop.trf.xlu1 }
 0x272   : > { %2478 = vst [vmem:[%s4572_s17 + $0x148] sm:$0xff] %v2367_v37  ;;  %v2340_v55 = vpop.trf.xlu0 }
 0x273   : > { %2497 = vst [vmem:[%s4572_s17 + $0x1e0] sm:$0xff] %v2340_v55 }
 0x275   : > { %v2368_v14 = vpop.trf.xlu1 }
 0x276   : > { %2482 = vst [vmem:[%s4572_s17 + $0x168] sm:$0xff] %v2368_v14  ;;  %v2389_v53 = vpop.trf.xlu0 }
 0x277   : > { %2439 = vst [vmem:[%s4572_s17 + $0x10] sm:$0xff] %v2389_v53 }
 0x279   : > { %v2369_v6 = vpop.trf.xlu1 }
 0x27a   : > { %2486 = vst [vmem:[%s4572_s17 + $0x188] sm:$0xff] %v2369_v6  ;;  %v2390_v0 = vpop.trf.xlu0 }
 0x27b   : > { %2443 = vst [vmem:[%s4572_s17 + $0x30] sm:$0xff] %v2390_v0 }
 0x27d   : > { %v2370_v46 = vpop.trf.xlu1 }
 0x27e   : > { %2490 = vst [vmem:[%s4572_s17 + $0x1a8] sm:$0xff] %v2370_v46  ;;  %v2391_v11 = vpop.trf.xlu0 }
 0x27f   : > { %2447 = vst [vmem:[%s4572_s17 + $0x50] sm:$0xff] %v2391_v11 }
 0x281   : > { %v2371_v40 = vpop.trf.xlu1 }
 0x282   : > { %2494 = vst [vmem:[%s4572_s17 + $0x1c8] sm:$0xff] %v2371_v40  ;;  %v2392_v18 = vpop.trf.xlu0 }
 0x283   : > { %2451 = vst [vmem:[%s4572_s17 + $0x70] sm:$0xff] %v2392_v18 }
 0x285   : > { %v2372_v60 = vpop.trf.xlu1 }
 0x286   : > { %2498 = vst [vmem:[%s4572_s17 + $0x1e8] sm:$0xff] %v2372_v60  ;;  %v2393_v15 = vpop.trf.xlu0 }
 0x287   : > { %2455 = vst [vmem:[%s4572_s17 + $0x90] sm:$0xff] %v2393_v15 }
 0x289   : > { %v2421_v1 = vpop.trf.xlu1 }
 0x28a   : > { %2440 = vst [vmem:[%s4572_s17 + $0x18] sm:$0xff] %v2421_v1  ;;  %v2394_v33 = vpop.trf.xlu0 }
 0x28b   : > { %2459 = vst [vmem:[%s4572_s17 + $0xb0] sm:$0xff] %v2394_v33 }
 0x28d   : > { %v2422_v2 = vpop.trf.xlu1 }
 0x28e   : > { %2444 = vst [vmem:[%s4572_s17 + $0x38] sm:$0xff] %v2422_v2  ;;  %v2395_v39 = vpop.trf.xlu0 }
 0x28f   : > { %2463 = vst [vmem:[%s4572_s17 + $0xd0] sm:$0xff] %v2395_v39 }
 0x291   : > { %v2423_v29 = vpop.trf.xlu1 }
 0x292   : > { %2448 = vst [vmem:[%s4572_s17 + $0x58] sm:$0xff] %v2423_v29  ;;  %v2396_v50 = vpop.trf.xlu0 }
 0x293   : > { %2467 = vst [vmem:[%s4572_s17 + $0xf0] sm:$0xff] %v2396_v50 }
 0x295   : > { %v2424_v9 = vpop.trf.xlu1 }
 0x296   : > { %2452 = vst [vmem:[%s4572_s17 + $0x78] sm:$0xff] %v2424_v9  ;;  %v2397_v28 = vpop.trf.xlu0 }
 0x297   : > { %2471 = vst [vmem:[%s4572_s17 + $0x110] sm:$0xff] %v2397_v28 }
 0x299   : > { %v2425_v30 = vpop.trf.xlu1 }
 0x29a   : > { %2456 = vst [vmem:[%s4572_s17 + $0x98] sm:$0xff] %v2425_v30  ;;  %v2398_v12 = vpop.trf.xlu0 }
 0x29b   : > { %2475 = vst [vmem:[%s4572_s17 + $0x130] sm:$0xff] %v2398_v12 }
 0x29d   : > { %v2426_v32 = vpop.trf.xlu1 }
 0x29e   : > { %2460 = vst [vmem:[%s4572_s17 + $0xb8] sm:$0xff] %v2426_v32  ;;  %v2399_v17 = vpop.trf.xlu0 }
 0x29f   : > { %2479 = vst [vmem:[%s4572_s17 + $0x150] sm:$0xff] %v2399_v17 }
 0x2a1   : > { %v2427_v45 = vpop.trf.xlu1 }
 0x2a2   : > { %2464 = vst [vmem:[%s4572_s17 + $0xd8] sm:$0xff] %v2427_v45  ;;  %v2400_v4 = vpop.trf.xlu0 }
 0x2a3   : > { %2483 = vst [vmem:[%s4572_s17 + $0x170] sm:$0xff] %v2400_v4 }
 0x2a5   : > { %v2428_v27 = vpop.trf.xlu1 }
 0x2a6   : > { %2468 = vst [vmem:[%s4572_s17 + $0xf8] sm:$0xff] %v2428_v27  ;;  %v2401_v21 = vpop.trf.xlu0 }
 0x2a7   : > { %2487 = vst [vmem:[%s4572_s17 + $0x190] sm:$0xff] %v2401_v21 }
 0x2a9   : > { %v2429_v10 = vpop.trf.xlu1 }
 0x2aa   : > { %2472 = vst [vmem:[%s4572_s17 + $0x118] sm:$0xff] %v2429_v10  ;;  %v2402_v56 = vpop.trf.xlu0 }
 0x2ab   : > { %2491 = vst [vmem:[%s4572_s17 + $0x1b0] sm:$0xff] %v2402_v56 }
 0x2ad   : > { %v2430_v35 = vpop.trf.xlu1 }
 0x2ae   : > { %2476 = vst [vmem:[%s4572_s17 + $0x138] sm:$0xff] %v2430_v35  ;;  %v2403_v7 = vpop.trf.xlu0 }
 0x2af   : > { %2495 = vst [vmem:[%s4572_s17 + $0x1d0] sm:$0xff] %v2403_v7 }
 0x2b1   : > { %v2431_v19 = vpop.trf.xlu1 }
 0x2b2   : > { %2480 = vst [vmem:[%s4572_s17 + $0x158] sm:$0xff] %v2431_v19  ;;  %v2404_v26 = vpop.trf.xlu0 }
 0x2b3   : > { %2499 = vst [vmem:[%s4572_s17 + $0x1f0] sm:$0xff] %v2404_v26 }
 0x2b5   : > { %v2432_v44 = vpop.trf.xlu1 }
 0x2b6   : > { %2484 = vst [vmem:[%s4572_s17 + $0x178] sm:$0xff] %v2432_v44 }
 0x2b9   : > { %v2433_v52 = vpop.trf.xlu1 }
 0x2ba   : > { %2488 = vst [vmem:[%s4572_s17 + $0x198] sm:$0xff] %v2433_v52 }
 0x2bd   : > { %v2434_v54 = vpop.trf.xlu1 }
 0x2be   : > { %2492 = vst [vmem:[%s4572_s17 + $0x1b8] sm:$0xff] %v2434_v54 }
 0x2c1   : > { %v2435_v3 = vpop.trf.xlu1 }
 0x2c2   : > { %2496 = vst [vmem:[%s4572_s17 + $0x1d8] sm:$0xff] %v2435_v3 }
 0x2c5   : > { %v2436_v31 = vpop.trf.xlu1 }
 0x2c6   : > { %2500 = vst [vmem:[%s4572_s17 + $0x1f8] sm:$0xff] %v2436_v31 }
 0x2c7   : > { %2949 = shalt.err (!%p2946_p5)
}
 0x2c8   : > { %s2950_s11 = scalar_lea.hbm %s4654_s14, 8192  ;;  %s2954_s29 = scalar_lea.hbm %s4712_s5, 16384 }
 0x2c9   : > { %p2951_p6 = scmp.ne.s32.totalorder %s4654_s14, %s2950_s11  ;;  %p2955_p10 = scmp.lt.u32.totalorder %s4654_s14, %s4712_s5 }
 0x2ca   : > { %p2956_p11 = scmp.lt.u32.totalorder %s2954_s29, %s2950_s11  ;;  %p2958_p13 = scmp.lt.u32.totalorder %s2950_s11, %s4654_s14 }
 0x2cb   : > { %p2952_p7 = pnand %p2951_p6, %p3092_p4 }
 0x2cc   : > { %p2957_p12 = por %p2956_p11, %p2955_p10 }
 0x2cd   : > { %p2953_p9 = pneg %p2952_p7 }
 0x2ce   : > { %p2959_p0 = por %p2958_p13, %p2957_p12 }
 0x2d0   : > { %p2960_p1 = pnand %p2959_p0, %p2953_p9 }
 0x2d2   : > { %2963 = shalt.err (!%p2960_p1)
}
 0x2d3   : > { %s3020_s9 = smov 512   ;;  %s3021_s12 = smov 32  }
 0x2d4   : > { %2834 = dma.vmem_to_hbm [thread:$0]  (%p3092_p4), %s4656_s10, 8192, %s4654_s14, %s4661_s15, %s3020_s9, %s3020_s9, %s3021_s12  }
 0x2d5 PF: > { %p2840_p2 = scmp.ge.s32.totalorder %s3014_s23, 2  ;;  %s2532_s13 = sand.u32 1, %s2994_s18  }
 0x2d6   : > { %s2533_s16 = scalar_lea.sflag [#allocation3], %s2532_s13 }
 0x2d7   : > { %p2837_p3 = pnand %p2840_p2, %p3099_p8 }
 0x2d9   : > { %2989 = dma.done.wait (!%p2837_p3), %s2533_s16, 8192  }
 0x2da   : > { %2991 = vsyncadd (!%p2837_p3), %s2533_s16, 4294959104  ;;  %s18_s23 = sadd.s32 1, %s3014_s23   ;;  %s5074_s18 = smov %s2998_s19 }
 0x2db   : > { %p15_p5 = scmp.ge.s32.totalorder %s18_s23, 4   ;;  %s5075_s19 = smov %s3002_s20 }
 0x2dc   : > { %s5076_s20 = smov %s3105_s6  ;;  %s5077_s21 = smov %s3010_s22 }
 0x2dd   : > { %s5078_s22 = smov %s5080_s26  ;;  %17 = sbr.rel (!%p15_p5) target bundleno = 4 (0x4), region = 81 }
 0x2e4   :  { %2538 = vsyncpa [#allocation3], 1 }
 0x2e5   :  { %2540 = vsyncpa [#allocation3 + $0x1], 1 }

</bundles_post_ra>
